<compile_context>
chip_gen: v6e
topology: v6e:2x2x1
jax: 0.10.0
libtpu: 0.0.40
codegen_flags: <defaults>
</compile_context>

<pallas_src>
import functools
import numpy as np
import jax
import jax.numpy as jnp
from jax.experimental import pallas as pl
from jax.experimental.pallas import tpu as pltpu

PAD = 0                    # Constants.PAD
_NEG_BIG = -1e30           # finite mask value (avoids -inf -> NaN for all-PAD rows)
_MXU_WEIGHT_IDS = (0, 2, 4, 6, 10, 12)   # wq, wk, wv, fcw, w1, w2 -> cast to MXU dtype


# ---------------------------------------------------------------------------
# Sinusoid position table (exact re-implementation of the reference numpy code)
# ---------------------------------------------------------------------------
def get_sinusoid_encoding_table(n_position, d_hid, padding_idx=None):
    def cal_angle(position, hid_idx):
        return position / np.power(10000, 2 * (hid_idx // 2) / d_hid)

    table = np.array(
        [[cal_angle(pos, j) for j in range(d_hid)] for pos in range(n_position)],
        dtype=np.float64,
    )
    table[:, 0::2] = np.sin(table[:, 0::2])
    table[:, 1::2] = np.cos(table[:, 1::2])
    if padding_idx is not None:
        table[padding_idx] = 0.0
    return jnp.asarray(table, dtype=jnp.float32)


# ---------------------------------------------------------------------------
# Pallas kernel: full encoder stack; one grid step = (batch tile, layer)
# ---------------------------------------------------------------------------
def _encoder_stack_kernel(n_head, d_k, d_v, mxu_dtype,
                          kb_ref, npad_ref, x_ref,
                          wq_ref, bq_ref, wk_ref, bk_ref, wv_ref, bv_ref,
                          fcw_ref, fcb_ref, ln1g_ref, ln1b_ref,
                          w1_ref, b1_ref, w2_ref, b2_ref, ln2g_ref, ln2b_ref,
                          out_ref, act_ref, heads_ref):
    li = pl.program_id(1)
    n_layers = pl.num_programs(1)
    lowp = np.dtype(mxu_dtype) != np.dtype(np.float32)

    # First layer for this batch tile: load the embeddings into the resident VMEM carry.
    @pl.when(li == 0)
    def _():
        act_ref[...] = x_ref[...]

    Bt, L, D = act_ref.shape
    M = Bt * L                                      # matmul M-dim = rows of this tile

    x2 = act_ref[...].reshape(M, D)                 # (M, D) f32  (leading-dim merge only)
    xc = x2.astype(mxu_dtype)
    key_bias = kb_ref[...]                          # (Bt, 1, L): 0 or -1e30 additive mask
    npad3 = npad_ref[...]                           # (Bt, L, 1) non-pad mask (f32)

    # --- Multi-head self-attention ------------------------------------------------
    inv_temp = jnp.float32(1.0 / np.sqrt(d_k))
    for h in range(n_head):
        q0, q1 = h * d_k, (h + 1) * d_k
        v0, v1 = h * d_v, (h + 1) * d_v
        # Static slices of the *weight refs* (free views); activations stay lane-dense.
        q = jnp.dot(xc, wq_ref[0, :, q0:q1],
                    preferred_element_type=jnp.float32) + bq_ref[0, :, q0:q1]
        k = jnp.dot(xc, wk_ref[0, :, q0:q1],
                    preferred_element_type=jnp.float32) + bk_ref[0, :, q0:q1]
        v = jnp.dot(xc, wv_ref[0, :, v0:v1],
                    preferred_element_type=jnp.float32) + bv_ref[0, :, v0:v1]
        q3 = q.reshape(Bt, L, d_k)
        k3 = k.reshape(Bt, L, d_k)
        v3 = v.reshape(Bt, L, d_v)

        s = jnp.einsum('bqd,bkd->bqk', q3.astype(mxu_dtype), k3.astype(mxu_dtype),
                       preferred_element_type=jnp.float32)
        s = s * inv_temp + key_bias                 # (Bt, 1, L) broadcasts over queries
        m = jnp.max(s, axis=-1, keepdims=True)
        p = jnp.exp(s - m)
        denom = jnp.sum(p, axis=-1, keepdims=True)
        if lowp:
            attn = p * pl.reciprocal(denom, approx=True)   # EUP slot, ~free
        else:
            attn = p / denom
        o = jnp.einsum('bqk,bkd->bqd', attn.astype(mxu_dtype), v3.astype(mxu_dtype),
                       preferred_element_type=jnp.float32)        # (Bt, L, d_v)
        # Build the concatenated-head layout in scratch -> one fused output projection.
        heads_ref[:, v0:v1] = o.reshape(M, d_v)

    attn_out = jnp.dot(heads_ref[...].astype(mxu_dtype), fcw_ref[0],
                       preferred_element_type=jnp.float32) + fcb_ref[0]   # (M, D)

    # --- residual + LayerNorm 1 + non-pad mask ------------------------------------
    y = attn_out + x2
    mu = jnp.mean(y, axis=-1, keepdims=True)
    var = jnp.mean(jnp.square(y - mu), axis=-1, keepdims=True)
    y = (y - mu) * jax.lax.rsqrt(var + 1e-5) * ln1g_ref[0] + ln1b_ref[0]
    y = (y.reshape(Bt, L, D) * npad3).reshape(M, D)

    # --- position-wise FFN (Conv1d kernel_size=1 == matmul over features) ----------
    h1 = jnp.dot(y.astype(mxu_dtype), w1_ref[0],
                 preferred_element_type=jnp.float32) + b1_ref[0]
    h1 = jnp.maximum(h1, 0.0)
    f = jnp.dot(h1.astype(mxu_dtype), w2_ref[0],
                preferred_element_type=jnp.float32) + b2_ref[0]

    # --- residual + LayerNorm 2 + non-pad mask -------------------------------------
    z = f + y
    mu2 = jnp.mean(z, axis=-1, keepdims=True)
    var2 = jnp.mean(jnp.square(z - mu2), axis=-1, keepdims=True)
    z = (z - mu2) * jax.lax.rsqrt(var2 + 1e-5) * ln2g_ref[0] + ln2b_ref[0]
    z3 = z.reshape(Bt, L, D) * npad3

    act_ref[...] = z3                               # carry to the next layer (stays in VMEM)

    @pl.when(li == n_layers - 1)
    def _():
        out_ref[...] = z3                           # final layer -> write the output block


# ---------------------------------------------------------------------------
# Wrapper: pick the batch tile, stack per-layer weights, launch one pallas_call
# ---------------------------------------------------------------------------
def _pick_block_b(B, L, target_rows=256, min_rows=128):
    """Largest divisor of B with block_b*L <= target_rows (fill the MXU / amortize
    per-step overhead). Prefer >= 2 batch tiles (v7x has 2 TensorCores) only if each
    tile still keeps >= min_rows rows."""
    best = 1
    for bb in range(1, B + 1):
        if B % bb == 0 and bb * L <= max(target_rows, L):
            best = bb
    if B // best < 2:
        for bb in range(best - 1, 0, -1):
            if B % bb == 0 and bb * L >= min_rows:
                best = bb
                break
    return best


def _stack_layer_params(layer_params_list, mxu_dtype):
    stacked = []
    for i in range(len(layer_params_list[0])):
        a = jnp.stack([lp[i] for lp in layer_params_list], axis=0)   # (n_layers, ...)
        if i in _MXU_WEIGHT_IDS:
            a = a.astype(mxu_dtype)       # bf16 weights: 2x MXU throughput, half the DMA
        stacked.append(a)
    return stacked


def encoder_forward(src_seq, src_pos, word_emb, pos_table, layer_params_list,
                    n_head, d_k, d_v, mxu_dtype=jnp.bfloat16, block_b=None):
    B, L = src_seq.shape
    D = word_emb.shape[1]
    n_layers = len(layer_params_list)

    # Embedding gathers stay in plain JAX (glue).
    x = (word_emb[src_seq] + pos_table[src_pos]).astype(jnp.float32)        # (B, L, D)
    # Additive key-padding bias (finite -1e30 -> NaN-safe), lane-dense layout.
    key_bias = jnp.where(src_seq == PAD, jnp.float32(_NEG_BIG),
                         jnp.float32(0.0))[:, None, :]                      # (B, 1, L)
    non_pad = (src_seq != PAD).astype(jnp.float32)[:, :, None]              # (B, L, 1)

    stacked = _stack_layer_params(layer_params_list, mxu_dtype)
    if block_b is None:
        block_b = _pick_block_b(B, L)
    assert B % block_b == 0
    grid = (B // block_b, n_layers)                 # layers innermost -> weights pipelined

    in_specs = [
        pl.BlockSpec((block_b, 1, L), lambda b, l: (b, 0, 0)),   # key-pad bias
        pl.BlockSpec((block_b, L, 1), lambda b, l: (b, 0, 0)),   # non-pad mask (tiny, 1 fetch/tile)
        pl.BlockSpec((block_b, L, D), lambda b, l: (b, 0, 0)),   # embeddings
    ] + [
        pl.BlockSpec((1,) + w.shape[1:], lambda b, l: (l, 0, 0)) for w in stacked
    ]
    out_specs = pl.BlockSpec((block_b, L, D), lambda b, l: (b, 0, 0))

    kernel = functools.partial(_encoder_stack_kernel, n_head, d_k, d_v, mxu_dtype)
    return pl.pallas_call(
        kernel,
        out_shape=jax.ShapeDtypeStruct((B, L, D), jnp.float32),
        grid=grid,
        in_specs=in_specs,
        out_specs=out_specs,
        scratch_shapes=[
            pltpu.VMEM((block_b, L, D), jnp.float32),                 # layer-to-layer carry
            pltpu.VMEM((block_b * L, n_head * d_v), jnp.float32),     # concat head outputs
        ],
        compiler_params=pltpu.CompilerParams(
            dimension_semantics=("parallel", "arbitrary"),
            vmem_limit_bytes=32 * 1024 * 1024),
    )(key_bias, non_pad, x, *stacked)


# ---------------------------------------------------------------------------
# Deterministic parameter init
# ---------------------------------------------------------------------------
def init_layer_params(key, d_model, d_inner, n_head, d_k, d_v):
    ks = jax.random.split(key, 10)

    def nrm(k, shape, scale):
        return (scale * jax.random.normal(k, shape)).astype(jnp.float32)

    wq = nrm(ks[0], (d_model, n_head * d_k), np.sqrt(2.0 / (d_model + d_k)))
    wk = nrm(ks[1], (d_model, n_head * d_k), np.sqrt(2.0 / (d_model + d_k)))
    wv = nrm(ks[2], (d_model, n_head * d_v), np.sqrt(2.0 / (d_model + d_v)))
    bq = nrm(ks[3], (1, n_head * d_k), 0.02)
    bk = nrm(ks[4], (1, n_head * d_k), 0.02)
    bv = nrm(ks[5], (1, n_head * d_v), 0.02)
    fcw = nrm(ks[6], (n_head * d_v, d_model), 1.0 / np.sqrt(d_model))
    fcb = jnp.zeros((1, d_model), jnp.float32)
    ln1g = jnp.ones((1, d_model), jnp.float32)
    ln1b = jnp.zeros((1, d_model), jnp.float32)
    w1 = nrm(ks[7], (d_model, d_inner), 1.0 / np.sqrt(d_model))
    b1 = nrm(ks[8], (1, d_inner), 0.02)
    w2 = nrm(ks[9], (d_inner, d_model), 1.0 / np.sqrt(d_inner))
    b2 = jnp.zeros((1, d_model), jnp.float32)
    ln2g = jnp.ones((1, d_model), jnp.float32)
    ln2b = jnp.zeros((1, d_model), jnp.float32)
    return [wq, bq, wk, bk, wv, bv, fcw, fcb, ln1g, ln1b,
            w1, b1, w2, b2, ln2g, ln2b]


# ---------------------------------------------------------------------------
# NumPy reference (mirrors the PyTorch forward exactly, dropout disabled)
# ---------------------------------------------------------------------------
def reference_encoder(src_seq, src_pos, word_emb, pos_table, layer_params_list,
                      n_head, d_k, d_v):
    src_seq = np.asarray(src_seq)
    src_pos = np.asarray(src_pos)
    B, L = src_seq.shape
    x = np.asarray(word_emb)[src_seq] + np.asarray(pos_table)[src_pos]
    x = x.astype(np.float32)
    key_pad = (src_seq == PAD)                                  # (B, L)
    slf_mask = np.broadcast_to(key_pad[:, None, :], (B, L, L))  # (B, Lq, Lk)
    non_pad = (src_seq != PAD).astype(np.float32)[:, :, None]   # (B, L, 1)
    for lp in layer_params_list:
        (wq, bq, wk, bk, wv, bv, fcw, fcb, ln1g, ln1b,
         w1, b1, w2, b2, ln2g, ln2b) = [np.asarray(a) for a in lp]
        residual = x
        q = (x @ wq + bq).reshape(B, L, n_head, d_k).transpose(0, 2, 1, 3)
        k = (x @ wk + bk).reshape(B, L, n_head, d_k).transpose(0, 2, 1, 3)
        v = (x @ wv + bv).reshape(B, L, n_head, d_v).transpose(0, 2, 1, 3)
        scores = (q @ k.transpose(0, 1, 3, 2)) / np.power(d_k, 0.5)
        scores = np.where(slf_mask[:, None, :, :], -np.inf, scores)
        scores = scores - scores.max(-1, keepdims=True)
        p = np.exp(scores)
        attn = p / p.sum(-1, keepdims=True)
        o = (attn @ v).transpose(0, 2, 1, 3).reshape(B, L, n_head * d_v)
        o = o @ fcw + fcb
        y = o + residual
        mu = y.mean(-1, keepdims=True)
        var = ((y - mu) ** 2).mean(-1, keepdims=True)
        y = (y - mu) / np.sqrt(var + 1e-5) * ln1g + ln1b
        y = y * non_pad
        h1 = np.maximum(y @ w1 + b1, 0.0)
        f = h1 @ w2 + b2
        z = f + y
        mu = z.mean(-1, keepdims=True)
        var = ((z - mu) ** 2).mean(-1, keepdims=True)
        z = (z - mu) / np.sqrt(var + 1e-5) * ln2g + ln2b
        x = z * non_pad
    return x


# ---------------------------------------------------------------------------
if __name__ == "__main__":
    # Small shapes consistent with the module
    B, L = 2, 8
    n_src_vocab, len_max_seq = 16, 8
    d_word_vec = d_model = 32
    n_layers, n_head, d_k, d_v, d_inner = 2, 4, 8, 8, 64

    key = jax.random.PRNGKey(0)
    key, k_seq, k_emb = jax.random.split(key, 3)

    # Inputs: token ids in [1, vocab), with some PAD tokens in batch 1
    src_seq = jax.random.randint(k_seq, (B, L), 1, n_src_vocab, dtype=jnp.int32)
    src_seq = src_seq.at[1, 6:].set(PAD)
    positions = jnp.arange(1, L + 1, dtype=jnp.int32)[None, :]
    src_pos = jnp.where(src_seq != PAD, positions, 0).astype(jnp.int32)

    # Parameters
    word_emb = (0.5 * jax.random.normal(k_emb, (n_src_vocab, d_word_vec))).astype(jnp.float32)
    word_emb = word_emb.at[PAD].set(0.0)  # padding_idx=PAD
    pos_table = get_sinusoid_encoding_table(len_max_seq + 1, d_word_vec, padding_idx=0)
    layer_keys = jax.random.split(key, n_layers)
    layer_params_list = [init_layer_params(layer_keys[i], d_model, d_inner,
                                           n_head, d_k, d_v)
                         for i in range(n_layers)]

    ref = reference_encoder(src_seq, src_pos, word_emb, pos_table,
                            layer_params_list, n_head, d_k, d_v)

    # f32 MXU path: tight correctness check against the numpy reference.
    out_f32 = encoder_forward(src_seq, src_pos, word_emb, pos_table,
                              layer_params_list, n_head, d_k, d_v,
                              mxu_dtype=jnp.float32)
    out_f32 = jax.block_until_ready(out_f32)
    err_f32 = float(np.max(np.abs(np.asarray(out_f32) - ref)))

    # bf16 MXU path (default fast config): looser check (bf16 inputs, f32 accumulation).
    out_bf16 = encoder_forward(src_seq, src_pos, word_emb, pos_table,
                               layer_params_list, n_head, d_k, d_v,
                               mxu_dtype=jnp.bfloat16)
    out_bf16 = jax.block_until_ready(out_bf16)
    err_bf16 = float(np.max(np.abs(np.asarray(out_bf16) - ref)))

    assert out_f32.shape == (B, L, d_model), out_f32.shape
    assert out_bf16.shape == (B, L, d_model), out_bf16.shape
    assert np.isfinite(np.asarray(out_f32)).all()
    assert np.isfinite(np.asarray(out_bf16)).all()
    assert err_f32 < 2e-3, f"f32 path: max abs diff vs reference {err_f32}"
    assert err_bf16 < 0.25, f"bf16 path: max abs diff vs reference {err_bf16}"
    print("KERNEL_OK")
</pallas_src>

<mosaic_0001>
module attributes {stable_mosaic.version = 11 : i64} {
  func.func @_encoder_stack_kernel(%arg0: i32, %arg1: i32, %arg2: memref<2x1x8xf32, #tpu.memory_space<vmem>>, %arg3: memref<2x8x1xf32, #tpu.memory_space<vmem>>, %arg4: memref<2x8x32xf32, #tpu.memory_space<vmem>>, %arg5: memref<1x32x32xf32, #tpu.memory_space<vmem>>, %arg6: memref<1x1x32xf32, #tpu.memory_space<vmem>>, %arg7: memref<1x32x32xf32, #tpu.memory_space<vmem>>, %arg8: memref<1x1x32xf32, #tpu.memory_space<vmem>>, %arg9: memref<1x32x32xf32, #tpu.memory_space<vmem>>, %arg10: memref<1x1x32xf32, #tpu.memory_space<vmem>>, %arg11: memref<1x32x32xf32, #tpu.memory_space<vmem>>, %arg12: memref<1x1x32xf32, #tpu.memory_space<vmem>>, %arg13: memref<1x1x32xf32, #tpu.memory_space<vmem>>, %arg14: memref<1x1x32xf32, #tpu.memory_space<vmem>>, %arg15: memref<1x32x64xf32, #tpu.memory_space<vmem>>, %arg16: memref<1x1x64xf32, #tpu.memory_space<vmem>>, %arg17: memref<1x64x32xf32, #tpu.memory_space<vmem>>, %arg18: memref<1x1x32xf32, #tpu.memory_space<vmem>>, %arg19: memref<1x1x32xf32, #tpu.memory_space<vmem>>, %arg20: memref<1x1x32xf32, #tpu.memory_space<vmem>>, %arg21: memref<2x8x32xf32, #tpu.memory_space<vmem>>, %arg22: memref<2x8x32xf32, #tpu.memory_space<vmem>>, %arg23: memref<16x32xf32, #tpu.memory_space<vmem>>) attributes {dimension_semantics = [#tpu.dimension_semantics<parallel>, #tpu.dimension_semantics<arbitrary>], iteration_bounds = array<i64: 1, 2>, scalar_prefetch = 0 : i64, scratch_operands = 2 : i64, tpu.core_type = #tpu.core_type<tc>, window_params = [{transform_indices = @transform_0, window_bounds = array<i64: 2, 1, 8>}, {transform_indices = @transform_1, window_bounds = array<i64: 2, 8, 1>}, {transform_indices = @transform_2, window_bounds = array<i64: 2, 8, 32>}, {transform_indices = @transform_3, window_bounds = array<i64: 1, 32, 32>}, {transform_indices = @transform_4, window_bounds = array<i64: 1, 1, 32>}, {transform_indices = @transform_5, window_bounds = array<i64: 1, 32, 32>}, {transform_indices = @transform_6, window_bounds = array<i64: 1, 1, 32>}, {transform_indices = @transform_7, window_bounds = array<i64: 1, 32, 32>}, {transform_indices = @transform_8, window_bounds = array<i64: 1, 1, 32>}, {transform_indices = @transform_9, window_bounds = array<i64: 1, 32, 32>}, {transform_indices = @transform_10, window_bounds = array<i64: 1, 1, 32>}, {transform_indices = @transform_11, window_bounds = array<i64: 1, 1, 32>}, {transform_indices = @transform_12, window_bounds = array<i64: 1, 1, 32>}, {transform_indices = @transform_13, window_bounds = array<i64: 1, 32, 64>}, {transform_indices = @transform_14, window_bounds = array<i64: 1, 1, 64>}, {transform_indices = @transform_15, window_bounds = array<i64: 1, 64, 32>}, {transform_indices = @transform_16, window_bounds = array<i64: 1, 1, 32>}, {transform_indices = @transform_17, window_bounds = array<i64: 1, 1, 32>}, {transform_indices = @transform_18, window_bounds = array<i64: 1, 1, 32>}, {transform_indices = @transform_19, window_bounds = array<i64: 2, 8, 32>}]} {
    %c0_i32 = arith.constant 0 : i32
    %0 = arith.cmpi eq, %arg1, %c0_i32 : i32
    %1 = arith.extui %0 : i1 to i32
    %c0_i32_0 = arith.constant 0 : i32
    %2 = arith.cmpi ne, %1, %c0_i32_0 : i32
    scf.if %2 {
      %c0_167 = arith.constant 0 : index
      %c0_168 = arith.constant 0 : index
      %c0_169 = arith.constant 0 : index
      %260 = vector.load %arg4[%c0_167, %c0_168, %c0_169] : memref<2x8x32xf32, #tpu.memory_space<vmem>>, vector<2x8x32xf32>
      %c0_170 = arith.constant 0 : index
      %c0_171 = arith.constant 0 : index
      %c0_172 = arith.constant 0 : index
      %261 = vector.load %arg22[%c0_170, %c0_171, %c0_172] : memref<2x8x32xf32, #tpu.memory_space<vmem>>, vector<2x8x32xf32>
      tpu.vector_store %arg22[%c0_170, %c0_171, %c0_172], %260 {strides = array<i32>} : memref<2x8x32xf32, #tpu.memory_space<vmem>>, vector<2x8x32xf32>,
    } else {
    }
    %c0 = arith.constant 0 : index
    %c0_1 = arith.constant 0 : index
    %c0_2 = arith.constant 0 : index
    %3 = vector.load %arg22[%c0, %c0_1, %c0_2] : memref<2x8x32xf32, #tpu.memory_space<vmem>>, vector<2x8x32xf32>
    %4 = vector.shape_cast %3 : vector<2x8x32xf32> to vector<16x32xf32>
    %c0_3 = arith.constant 0 : index
    %c0_4 = arith.constant 0 : index
    %c0_5 = arith.constant 0 : index
    %5 = vector.load %arg2[%c0_3, %c0_4, %c0_5] : memref<2x1x8xf32, #tpu.memory_space<vmem>>, vector<2x1x8xf32>
    %c0_6 = arith.constant 0 : index
    %c0_7 = arith.constant 0 : index
    %c0_8 = arith.constant 0 : index
    %6 = vector.load %arg3[%c0_6, %c0_7, %c0_8] : memref<2x8x1xf32, #tpu.memory_space<vmem>>, vector<2x8x1xf32>
    %c0_9 = arith.constant 0 : index
    %c0_10 = arith.constant 0 : index
    %c0_11 = arith.constant 0 : index
    %7 = vector.load %arg5[%c0_9, %c0_10, %c0_11] : memref<1x32x32xf32, #tpu.memory_space<vmem>>, vector<1x32x8xf32>
    %8 = vector.shape_cast %7 : vector<1x32x8xf32> to vector<32x8xf32>
    %cst = arith.constant dense<0.000000e+00> : vector<16x8xf32>
    %9 = tpu.matmul %4, %8, %cst {dimension_numbers = #tpu.dot_dimension_numbers<[1], [0], [0], [1], [0, 0, 1, 1], [], []>} : vector<16x32xf32>, vector<32x8xf32>, vector<16x8xf32> -> vector<16x8xf32>
    %c0_12 = arith.constant 0 : index
    %c0_13 = arith.constant 0 : index
    %c0_14 = arith.constant 0 : index
    %10 = vector.load %arg6[%c0_12, %c0_13, %c0_14] : memref<1x1x32xf32, #tpu.memory_space<vmem>>, vector<1x1x8xf32>
    %11 = vector.shape_cast %10 : vector<1x1x8xf32> to vector<1x8xf32>
    %12 = vector.broadcast %11 : vector<1x8xf32> to vector<16x8xf32>
    %13 = arith.addf %9, %12 : vector<16x8xf32>
    %c0_15 = arith.constant 0 : index
    %c0_16 = arith.constant 0 : index
    %c0_17 = arith.constant 0 : index
    %14 = vector.load %arg7[%c0_15, %c0_16, %c0_17] : memref<1x32x32xf32, #tpu.memory_space<vmem>>, vector<1x32x8xf32>
    %15 = vector.shape_cast %14 : vector<1x32x8xf32> to vector<32x8xf32>
    %cst_18 = arith.constant dense<0.000000e+00> : vector<16x8xf32>
    %16 = tpu.matmul %4, %15, %cst_18 {dimension_numbers = #tpu.dot_dimension_numbers<[1], [0], [0], [1], [0, 0, 1, 1], [], []>} : vector<16x32xf32>, vector<32x8xf32>, vector<16x8xf32> -> vector<16x8xf32>
    %c0_19 = arith.constant 0 : index
    %c0_20 = arith.constant 0 : index
    %c0_21 = arith.constant 0 : index
    %17 = vector.load %arg8[%c0_19, %c0_20, %c0_21] : memref<1x1x32xf32, #tpu.memory_space<vmem>>, vector<1x1x8xf32>
    %18 = vector.shape_cast %17 : vector<1x1x8xf32> to vector<1x8xf32>
    %19 = vector.broadcast %18 : vector<1x8xf32> to vector<16x8xf32>
    %20 = arith.addf %16, %19 : vector<16x8xf32>
    %c0_22 = arith.constant 0 : index
    %c0_23 = arith.constant 0 : index
    %c0_24 = arith.constant 0 : index
    %21 = vector.load %arg9[%c0_22, %c0_23, %c0_24] : memref<1x32x32xf32, #tpu.memory_space<vmem>>, vector<1x32x8xf32>
    %22 = vector.shape_cast %21 : vector<1x32x8xf32> to vector<32x8xf32>
    %cst_25 = arith.constant dense<0.000000e+00> : vector<16x8xf32>
    %23 = tpu.matmul %4, %22, %cst_25 {dimension_numbers = #tpu.dot_dimension_numbers<[1], [0], [0], [1], [0, 0, 1, 1], [], []>} : vector<16x32xf32>, vector<32x8xf32>, vector<16x8xf32> -> vector<16x8xf32>
    %c0_26 = arith.constant 0 : index
    %c0_27 = arith.constant 0 : index
    %c0_28 = arith.constant 0 : index
    %24 = vector.load %arg10[%c0_26, %c0_27, %c0_28] : memref<1x1x32xf32, #tpu.memory_space<vmem>>, vector<1x1x8xf32>
    %25 = vector.shape_cast %24 : vector<1x1x8xf32> to vector<1x8xf32>
    %26 = vector.broadcast %25 : vector<1x8xf32> to vector<16x8xf32>
    %27 = arith.addf %23, %26 : vector<16x8xf32>
    %28 = vector.shape_cast %13 : vector<16x8xf32> to vector<2x8x8xf32>
    %29 = vector.shape_cast %20 : vector<16x8xf32> to vector<2x8x8xf32>
    %30 = vector.shape_cast %27 : vector<16x8xf32> to vector<2x8x8xf32>
    "tpu.trace_start"() <{level = 10 : i32, message = "bqd,bkd->bqk"}> : () -> ()
    %cst_29 = arith.constant dense<0.000000e+00> : vector<2x8x8xf32>
    %31 = tpu.matmul %28, %29, %cst_29 {dimension_numbers = #tpu.dot_dimension_numbers<[2], [2], [1], [1], [0, 0, 0, 1, 1, 1], [0], [0]>} : vector<2x8x8xf32>, vector<2x8x8xf32>, vector<2x8x8xf32> -> vector<2x8x8xf32>
    "tpu.trace_stop"() : () -> ()
    %cst_30 = arith.constant 0.353553385 : f32
    %32 = vector.broadcast %cst_30 : f32 to vector<2x8x8xf32>
    %33 = arith.mulf %31, %32 : vector<2x8x8xf32>
    %34 = vector.broadcast %5 : vector<2x1x8xf32> to vector<2x8x8xf32>
    %35 = arith.addf %33, %34 : vector<2x8x8xf32>
    %cst_31 = arith.constant dense<0xFF800000> : vector<2x8xf32>
    %36 = vector.multi_reduction <maximumf>, %35, %cst_31 [2] : vector<2x8x8xf32> to vector<2x8xf32>
    %37 = vector.shape_cast %36 : vector<2x8xf32> to vector<2x8x1xf32>
    %38 = vector.broadcast %37 : vector<2x8x1xf32> to vector<2x8x8xf32>
    %39 = arith.subf %35, %38 : vector<2x8x8xf32>
    %40 = math.exp %39 : vector<2x8x8xf32>
    %cst_32 = arith.constant dense<0.000000e+00> : vector<2x8xf32>
    %41 = vector.multi_reduction <add>, %40, %cst_32 [2] : vector<2x8x8xf32> to vector<2x8xf32>
    %42 = vector.shape_cast %41 : vector<2x8xf32> to vector<2x8x1xf32>
    %43 = vector.broadcast %42 : vector<2x8x1xf32> to vector<2x8x8xf32>
    %44 = arith.divf %40, %43 : vector<2x8x8xf32>
    "tpu.trace_start"() <{level = 10 : i32, message = "bqk,bkd->bqd"}> : () -> ()
    %cst_33 = arith.constant dense<0.000000e+00> : vector<2x8x8xf32>
    %45 = tpu.matmul %44, %30, %cst_33 {dimension_numbers = #tpu.dot_dimension_numbers<[2], [1], [1], [2], [0, 0, 0, 1, 1, 2], [0], [0]>} : vector<2x8x8xf32>, vector<2x8x8xf32>, vector<2x8x8xf32> -> vector<2x8x8xf32>
    "tpu.trace_stop"() : () -> ()
    %46 = vector.shape_cast %45 : vector<2x8x8xf32> to vector<16x8xf32>
    %c0_34 = arith.constant 0 : index
    %c0_35 = arith.constant 0 : index
    %47 = vector.load %arg23[%c0_34, %c0_35] : memref<16x32xf32, #tpu.memory_space<vmem>>, vector<16x8xf32>
    tpu.vector_store %arg23[%c0_34, %c0_35], %46 {strides = array<i32>} : memref<16x32xf32, #tpu.memory_space<vmem>>, vector<16x8xf32>,
    %c0_36 = arith.constant 0 : index
    %c0_37 = arith.constant 0 : index
    %c8 = arith.constant 8 : index
    %48 = vector.load %arg5[%c0_36, %c0_37, %c8] : memref<1x32x32xf32, #tpu.memory_space<vmem>>, vector<1x32x8xf32>
    %49 = vector.shape_cast %48 : vector<1x32x8xf32> to vector<32x8xf32>
    %cst_38 = arith.constant dense<0.000000e+00> : vector<16x8xf32>
    %50 = tpu.matmul %4, %49, %cst_38 {dimension_numbers = #tpu.dot_dimension_numbers<[1], [0], [0], [1], [0, 0, 1, 1], [], []>} : vector<16x32xf32>, vector<32x8xf32>, vector<16x8xf32> -> vector<16x8xf32>
    %c0_39 = arith.constant 0 : index
    %c0_40 = arith.constant 0 : index
    %c8_41 = arith.constant 8 : index
    %51 = vector.load %arg6[%c0_39, %c0_40, %c8_41] : memref<1x1x32xf32, #tpu.memory_space<vmem>>, vector<1x1x8xf32>
    %52 = vector.shape_cast %51 : vector<1x1x8xf32> to vector<1x8xf32>
    %53 = vector.broadcast %52 : vector<1x8xf32> to vector<16x8xf32>
    %54 = arith.addf %50, %53 : vector<16x8xf32>
    %c0_42 = arith.constant 0 : index
    %c0_43 = arith.constant 0 : index
    %c8_44 = arith.constant 8 : index
    %55 = vector.load %arg7[%c0_42, %c0_43, %c8_44] : memref<1x32x32xf32, #tpu.memory_space<vmem>>, vector<1x32x8xf32>
    %56 = vector.shape_cast %55 : vector<1x32x8xf32> to vector<32x8xf32>
    %cst_45 = arith.constant dense<0.000000e+00> : vector<16x8xf32>
    %57 = tpu.matmul %4, %56, %cst_45 {dimension_numbers = #tpu.dot_dimension_numbers<[1], [0], [0], [1], [0, 0, 1, 1], [], []>} : vector<16x32xf32>, vector<32x8xf32>, vector<16x8xf32> -> vector<16x8xf32>
    %c0_46 = arith.constant 0 : index
    %c0_47 = arith.constant 0 : index
    %c8_48 = arith.constant 8 : index
    %58 = vector.load %arg8[%c0_46, %c0_47, %c8_48] : memref<1x1x32xf32, #tpu.memory_space<vmem>>, vector<1x1x8xf32>
    %59 = vector.shape_cast %58 : vector<1x1x8xf32> to vector<1x8xf32>
    %60 = vector.broadcast %59 : vector<1x8xf32> to vector<16x8xf32>
    %61 = arith.addf %57, %60 : vector<16x8xf32>
    %c0_49 = arith.constant 0 : index
    %c0_50 = arith.constant 0 : index
    %c8_51 = arith.constant 8 : index
    %62 = vector.load %arg9[%c0_49, %c0_50, %c8_51] : memref<1x32x32xf32, #tpu.memory_space<vmem>>, vector<1x32x8xf32>
    %63 = vector.shape_cast %62 : vector<1x32x8xf32> to vector<32x8xf32>
    %cst_52 = arith.constant dense<0.000000e+00> : vector<16x8xf32>
    %64 = tpu.matmul %4, %63, %cst_52 {dimension_numbers = #tpu.dot_dimension_numbers<[1], [0], [0], [1], [0, 0, 1, 1], [], []>} : vector<16x32xf32>, vector<32x8xf32>, vector<16x8xf32> -> vector<16x8xf32>
    %c0_53 = arith.constant 0 : index
    %c0_54 = arith.constant 0 : index
    %c8_55 = arith.constant 8 : index
    %65 = vector.load %arg10[%c0_53, %c0_54, %c8_55] : memref<1x1x32xf32, #tpu.memory_space<vmem>>, vector<1x1x8xf32>
    %66 = vector.shape_cast %65 : vector<1x1x8xf32> to vector<1x8xf32>
    %67 = vector.broadcast %66 : vector<1x8xf32> to vector<16x8xf32>
    %68 = arith.addf %64, %67 : vector<16x8xf32>
    %69 = vector.shape_cast %54 : vector<16x8xf32> to vector<2x8x8xf32>
    %70 = vector.shape_cast %61 : vector<16x8xf32> to vector<2x8x8xf32>
    %71 = vector.shape_cast %68 : vector<16x8xf32> to vector<2x8x8xf32>
    "tpu.trace_start"() <{level = 10 : i32, message = "bqd,bkd->bqk"}> : () -> ()
    %cst_56 = arith.constant dense<0.000000e+00> : vector<2x8x8xf32>
    %72 = tpu.matmul %69, %70, %cst_56 {dimension_numbers = #tpu.dot_dimension_numbers<[2], [2], [1], [1], [0, 0, 0, 1, 1, 1], [0], [0]>} : vector<2x8x8xf32>, vector<2x8x8xf32>, vector<2x8x8xf32> -> vector<2x8x8xf32>
    "tpu.trace_stop"() : () -> ()
    %cst_57 = arith.constant 0.353553385 : f32
    %73 = vector.broadcast %cst_57 : f32 to vector<2x8x8xf32>
    %74 = arith.mulf %72, %73 : vector<2x8x8xf32>
    %75 = vector.broadcast %5 : vector<2x1x8xf32> to vector<2x8x8xf32>
    %76 = arith.addf %74, %75 : vector<2x8x8xf32>
    %cst_58 = arith.constant dense<0xFF800000> : vector<2x8xf32>
    %77 = vector.multi_reduction <maximumf>, %76, %cst_58 [2] : vector<2x8x8xf32> to vector<2x8xf32>
    %78 = vector.shape_cast %77 : vector<2x8xf32> to vector<2x8x1xf32>
    %79 = vector.broadcast %78 : vector<2x8x1xf32> to vector<2x8x8xf32>
    %80 = arith.subf %76, %79 : vector<2x8x8xf32>
    %81 = math.exp %80 : vector<2x8x8xf32>
    %cst_59 = arith.constant dense<0.000000e+00> : vector<2x8xf32>
    %82 = vector.multi_reduction <add>, %81, %cst_59 [2] : vector<2x8x8xf32> to vector<2x8xf32>
    %83 = vector.shape_cast %82 : vector<2x8xf32> to vector<2x8x1xf32>
    %84 = vector.broadcast %83 : vector<2x8x1xf32> to vector<2x8x8xf32>
    %85 = arith.divf %81, %84 : vector<2x8x8xf32>
    "tpu.trace_start"() <{level = 10 : i32, message = "bqk,bkd->bqd"}> : () -> ()
    %cst_60 = arith.constant dense<0.000000e+00> : vector<2x8x8xf32>
    %86 = tpu.matmul %85, %71, %cst_60 {dimension_numbers = #tpu.dot_dimension_numbers<[2], [1], [1], [2], [0, 0, 0, 1, 1, 2], [0], [0]>} : vector<2x8x8xf32>, vector<2x8x8xf32>, vector<2x8x8xf32> -> vector<2x8x8xf32>
    "tpu.trace_stop"() : () -> ()
    %87 = vector.shape_cast %86 : vector<2x8x8xf32> to vector<16x8xf32>
    %c0_61 = arith.constant 0 : index
    %c8_62 = arith.constant 8 : index
    %88 = vector.load %arg23[%c0_61, %c8_62] : memref<16x32xf32, #tpu.memory_space<vmem>>, vector<16x8xf32>
    tpu.vector_store %arg23[%c0_61, %c8_62], %87 {strides = array<i32>} : memref<16x32xf32, #tpu.memory_space<vmem>>, vector<16x8xf32>,
    %c0_63 = arith.constant 0 : index
    %c0_64 = arith.constant 0 : index
    %c16 = arith.constant 16 : index
    %89 = vector.load %arg5[%c0_63, %c0_64, %c16] : memref<1x32x32xf32, #tpu.memory_space<vmem>>, vector<1x32x8xf32>
    %90 = vector.shape_cast %89 : vector<1x32x8xf32> to vector<32x8xf32>
    %cst_65 = arith.constant dense<0.000000e+00> : vector<16x8xf32>
    %91 = tpu.matmul %4, %90, %cst_65 {dimension_numbers = #tpu.dot_dimension_numbers<[1], [0], [0], [1], [0, 0, 1, 1], [], []>} : vector<16x32xf32>, vector<32x8xf32>, vector<16x8xf32> -> vector<16x8xf32>
    %c0_66 = arith.constant 0 : index
    %c0_67 = arith.constant 0 : index
    %c16_68 = arith.constant 16 : index
    %92 = vector.load %arg6[%c0_66, %c0_67, %c16_68] : memref<1x1x32xf32, #tpu.memory_space<vmem>>, vector<1x1x8xf32>
    %93 = vector.shape_cast %92 : vector<1x1x8xf32> to vector<1x8xf32>
    %94 = vector.broadcast %93 : vector<1x8xf32> to vector<16x8xf32>
    %95 = arith.addf %91, %94 : vector<16x8xf32>
    %c0_69 = arith.constant 0 : index
    %c0_70 = arith.constant 0 : index
    %c16_71 = arith.constant 16 : index
    %96 = vector.load %arg7[%c0_69, %c0_70, %c16_71] : memref<1x32x32xf32, #tpu.memory_space<vmem>>, vector<1x32x8xf32>
    %97 = vector.shape_cast %96 : vector<1x32x8xf32> to vector<32x8xf32>
    %cst_72 = arith.constant dense<0.000000e+00> : vector<16x8xf32>
    %98 = tpu.matmul %4, %97, %cst_72 {dimension_numbers = #tpu.dot_dimension_numbers<[1], [0], [0], [1], [0, 0, 1, 1], [], []>} : vector<16x32xf32>, vector<32x8xf32>, vector<16x8xf32> -> vector<16x8xf32>
    %c0_73 = arith.constant 0 : index
    %c0_74 = arith.constant 0 : index
    %c16_75 = arith.constant 16 : index
    %99 = vector.load %arg8[%c0_73, %c0_74, %c16_75] : memref<1x1x32xf32, #tpu.memory_space<vmem>>, vector<1x1x8xf32>
    %100 = vector.shape_cast %99 : vector<1x1x8xf32> to vector<1x8xf32>
    %101 = vector.broadcast %100 : vector<1x8xf32> to vector<16x8xf32>
    %102 = arith.addf %98, %101 : vector<16x8xf32>
    %c0_76 = arith.constant 0 : index
    %c0_77 = arith.constant 0 : index
    %c16_78 = arith.constant 16 : index
    %103 = vector.load %arg9[%c0_76, %c0_77, %c16_78] : memref<1x32x32xf32, #tpu.memory_space<vmem>>, vector<1x32x8xf32>
    %104 = vector.shape_cast %103 : vector<1x32x8xf32> to vector<32x8xf32>
    %cst_79 = arith.constant dense<0.000000e+00> : vector<16x8xf32>
    %105 = tpu.matmul %4, %104, %cst_79 {dimension_numbers = #tpu.dot_dimension_numbers<[1], [0], [0], [1], [0, 0, 1, 1], [], []>} : vector<16x32xf32>, vector<32x8xf32>, vector<16x8xf32> -> vector<16x8xf32>
    %c0_80 = arith.constant 0 : index
    %c0_81 = arith.constant 0 : index
    %c16_82 = arith.constant 16 : index
    %106 = vector.load %arg10[%c0_80, %c0_81, %c16_82] : memref<1x1x32xf32, #tpu.memory_space<vmem>>, vector<1x1x8xf32>
    %107 = vector.shape_cast %106 : vector<1x1x8xf32> to vector<1x8xf32>
    %108 = vector.broadcast %107 : vector<1x8xf32> to vector<16x8xf32>
    %109 = arith.addf %105, %108 : vector<16x8xf32>
    %110 = vector.shape_cast %95 : vector<16x8xf32> to vector<2x8x8xf32>
    %111 = vector.shape_cast %102 : vector<16x8xf32> to vector<2x8x8xf32>
    %112 = vector.shape_cast %109 : vector<16x8xf32> to vector<2x8x8xf32>
    "tpu.trace_start"() <{level = 10 : i32, message = "bqd,bkd->bqk"}> : () -> ()
    %cst_83 = arith.constant dense<0.000000e+00> : vector<2x8x8xf32>
    %113 = tpu.matmul %110, %111, %cst_83 {dimension_numbers = #tpu.dot_dimension_numbers<[2], [2], [1], [1], [0, 0, 0, 1, 1, 1], [0], [0]>} : vector<2x8x8xf32>, vector<2x8x8xf32>, vector<2x8x8xf32> -> vector<2x8x8xf32>
    "tpu.trace_stop"() : () -> ()
    %cst_84 = arith.constant 0.353553385 : f32
    %114 = vector.broadcast %cst_84 : f32 to vector<2x8x8xf32>
    %115 = arith.mulf %113, %114 : vector<2x8x8xf32>
    %116 = vector.broadcast %5 : vector<2x1x8xf32> to vector<2x8x8xf32>
    %117 = arith.addf %115, %116 : vector<2x8x8xf32>
    %cst_85 = arith.constant dense<0xFF800000> : vector<2x8xf32>
    %118 = vector.multi_reduction <maximumf>, %117, %cst_85 [2] : vector<2x8x8xf32> to vector<2x8xf32>
    %119 = vector.shape_cast %118 : vector<2x8xf32> to vector<2x8x1xf32>
    %120 = vector.broadcast %119 : vector<2x8x1xf32> to vector<2x8x8xf32>
    %121 = arith.subf %117, %120 : vector<2x8x8xf32>
    %122 = math.exp %121 : vector<2x8x8xf32>
    %cst_86 = arith.constant dense<0.000000e+00> : vector<2x8xf32>
    %123 = vector.multi_reduction <add>, %122, %cst_86 [2] : vector<2x8x8xf32> to vector<2x8xf32>
    %124 = vector.shape_cast %123 : vector<2x8xf32> to vector<2x8x1xf32>
    %125 = vector.broadcast %124 : vector<2x8x1xf32> to vector<2x8x8xf32>
    %126 = arith.divf %122, %125 : vector<2x8x8xf32>
    "tpu.trace_start"() <{level = 10 : i32, message = "bqk,bkd->bqd"}> : () -> ()
    %cst_87 = arith.constant dense<0.000000e+00> : vector<2x8x8xf32>
    %127 = tpu.matmul %126, %112, %cst_87 {dimension_numbers = #tpu.dot_dimension_numbers<[2], [1], [1], [2], [0, 0, 0, 1, 1, 2], [0], [0]>} : vector<2x8x8xf32>, vector<2x8x8xf32>, vector<2x8x8xf32> -> vector<2x8x8xf32>
    "tpu.trace_stop"() : () -> ()
    %128 = vector.shape_cast %127 : vector<2x8x8xf32> to vector<16x8xf32>
    %c0_88 = arith.constant 0 : index
    %c16_89 = arith.constant 16 : index
    %129 = vector.load %arg23[%c0_88, %c16_89] : memref<16x32xf32, #tpu.memory_space<vmem>>, vector<16x8xf32>
    tpu.vector_store %arg23[%c0_88, %c16_89], %128 {strides = array<i32>} : memref<16x32xf32, #tpu.memory_space<vmem>>, vector<16x8xf32>,
    %c0_90 = arith.constant 0 : index
    %c0_91 = arith.constant 0 : index
    %c24 = arith.constant 24 : index
    %130 = vector.load %arg5[%c0_90, %c0_91, %c24] : memref<1x32x32xf32, #tpu.memory_space<vmem>>, vector<1x32x8xf32>
    %131 = vector.shape_cast %130 : vector<1x32x8xf32> to vector<32x8xf32>
    %cst_92 = arith.constant dense<0.000000e+00> : vector<16x8xf32>
    %132 = tpu.matmul %4, %131, %cst_92 {dimension_numbers = #tpu.dot_dimension_numbers<[1], [0], [0], [1], [0, 0, 1, 1], [], []>} : vector<16x32xf32>, vector<32x8xf32>, vector<16x8xf32> -> vector<16x8xf32>
    %c0_93 = arith.constant 0 : index
    %c0_94 = arith.constant 0 : index
    %c24_95 = arith.constant 24 : index
    %133 = vector.load %arg6[%c0_93, %c0_94, %c24_95] : memref<1x1x32xf32, #tpu.memory_space<vmem>>, vector<1x1x8xf32>
    %134 = vector.shape_cast %133 : vector<1x1x8xf32> to vector<1x8xf32>
    %135 = vector.broadcast %134 : vector<1x8xf32> to vector<16x8xf32>
    %136 = arith.addf %132, %135 : vector<16x8xf32>
    %c0_96 = arith.constant 0 : index
    %c0_97 = arith.constant 0 : index
    %c24_98 = arith.constant 24 : index
    %137 = vector.load %arg7[%c0_96, %c0_97, %c24_98] : memref<1x32x32xf32, #tpu.memory_space<vmem>>, vector<1x32x8xf32>
    %138 = vector.shape_cast %137 : vector<1x32x8xf32> to vector<32x8xf32>
    %cst_99 = arith.constant dense<0.000000e+00> : vector<16x8xf32>
    %139 = tpu.matmul %4, %138, %cst_99 {dimension_numbers = #tpu.dot_dimension_numbers<[1], [0], [0], [1], [0, 0, 1, 1], [], []>} : vector<16x32xf32>, vector<32x8xf32>, vector<16x8xf32> -> vector<16x8xf32>
    %c0_100 = arith.constant 0 : index
    %c0_101 = arith.constant 0 : index
    %c24_102 = arith.constant 24 : index
    %140 = vector.load %arg8[%c0_100, %c0_101, %c24_102] : memref<1x1x32xf32, #tpu.memory_space<vmem>>, vector<1x1x8xf32>
    %141 = vector.shape_cast %140 : vector<1x1x8xf32> to vector<1x8xf32>
    %142 = vector.broadcast %141 : vector<1x8xf32> to vector<16x8xf32>
    %143 = arith.addf %139, %142 : vector<16x8xf32>
    %c0_103 = arith.constant 0 : index
    %c0_104 = arith.constant 0 : index
    %c24_105 = arith.constant 24 : index
    %144 = vector.load %arg9[%c0_103, %c0_104, %c24_105] : memref<1x32x32xf32, #tpu.memory_space<vmem>>, vector<1x32x8xf32>
    %145 = vector.shape_cast %144 : vector<1x32x8xf32> to vector<32x8xf32>
    %cst_106 = arith.constant dense<0.000000e+00> : vector<16x8xf32>
    %146 = tpu.matmul %4, %145, %cst_106 {dimension_numbers = #tpu.dot_dimension_numbers<[1], [0], [0], [1], [0, 0, 1, 1], [], []>} : vector<16x32xf32>, vector<32x8xf32>, vector<16x8xf32> -> vector<16x8xf32>
    %c0_107 = arith.constant 0 : index
    %c0_108 = arith.constant 0 : index
    %c24_109 = arith.constant 24 : index
    %147 = vector.load %arg10[%c0_107, %c0_108, %c24_109] : memref<1x1x32xf32, #tpu.memory_space<vmem>>, vector<1x1x8xf32>
    %148 = vector.shape_cast %147 : vector<1x1x8xf32> to vector<1x8xf32>
    %149 = vector.broadcast %148 : vector<1x8xf32> to vector<16x8xf32>
    %150 = arith.addf %146, %149 : vector<16x8xf32>
    %151 = vector.shape_cast %136 : vector<16x8xf32> to vector<2x8x8xf32>
    %152 = vector.shape_cast %143 : vector<16x8xf32> to vector<2x8x8xf32>
    %153 = vector.shape_cast %150 : vector<16x8xf32> to vector<2x8x8xf32>
    "tpu.trace_start"() <{level = 10 : i32, message = "bqd,bkd->bqk"}> : () -> ()
    %cst_110 = arith.constant dense<0.000000e+00> : vector<2x8x8xf32>
    %154 = tpu.matmul %151, %152, %cst_110 {dimension_numbers = #tpu.dot_dimension_numbers<[2], [2], [1], [1], [0, 0, 0, 1, 1, 1], [0], [0]>} : vector<2x8x8xf32>, vector<2x8x8xf32>, vector<2x8x8xf32> -> vector<2x8x8xf32>
    "tpu.trace_stop"() : () -> ()
    %cst_111 = arith.constant 0.353553385 : f32
    %155 = vector.broadcast %cst_111 : f32 to vector<2x8x8xf32>
    %156 = arith.mulf %154, %155 : vector<2x8x8xf32>
    %157 = vector.broadcast %5 : vector<2x1x8xf32> to vector<2x8x8xf32>
    %158 = arith.addf %156, %157 : vector<2x8x8xf32>
    %cst_112 = arith.constant dense<0xFF800000> : vector<2x8xf32>
    %159 = vector.multi_reduction <maximumf>, %158, %cst_112 [2] : vector<2x8x8xf32> to vector<2x8xf32>
    %160 = vector.shape_cast %159 : vector<2x8xf32> to vector<2x8x1xf32>
    %161 = vector.broadcast %160 : vector<2x8x1xf32> to vector<2x8x8xf32>
    %162 = arith.subf %158, %161 : vector<2x8x8xf32>
    %163 = math.exp %162 : vector<2x8x8xf32>
    %cst_113 = arith.constant dense<0.000000e+00> : vector<2x8xf32>
    %164 = vector.multi_reduction <add>, %163, %cst_113 [2] : vector<2x8x8xf32> to vector<2x8xf32>
    %165 = vector.shape_cast %164 : vector<2x8xf32> to vector<2x8x1xf32>
    %166 = vector.broadcast %165 : vector<2x8x1xf32> to vector<2x8x8xf32>
    %167 = arith.divf %163, %166 : vector<2x8x8xf32>
    "tpu.trace_start"() <{level = 10 : i32, message = "bqk,bkd->bqd"}> : () -> ()
    %cst_114 = arith.constant dense<0.000000e+00> : vector<2x8x8xf32>
    %168 = tpu.matmul %167, %153, %cst_114 {dimension_numbers = #tpu.dot_dimension_numbers<[2], [1], [1], [2], [0, 0, 0, 1, 1, 2], [0], [0]>} : vector<2x8x8xf32>, vector<2x8x8xf32>, vector<2x8x8xf32> -> vector<2x8x8xf32>
    "tpu.trace_stop"() : () -> ()
    %169 = vector.shape_cast %168 : vector<2x8x8xf32> to vector<16x8xf32>
    %c0_115 = arith.constant 0 : index
    %c24_116 = arith.constant 24 : index
    %170 = vector.load %arg23[%c0_115, %c24_116] : memref<16x32xf32, #tpu.memory_space<vmem>>, vector<16x8xf32>
    tpu.vector_store %arg23[%c0_115, %c24_116], %169 {strides = array<i32>} : memref<16x32xf32, #tpu.memory_space<vmem>>, vector<16x8xf32>,
    %c0_117 = arith.constant 0 : index
    %c0_118 = arith.constant 0 : index
    %171 = vector.load %arg23[%c0_117, %c0_118] : memref<16x32xf32, #tpu.memory_space<vmem>>, vector<16x32xf32>
    %c0_119 = arith.constant 0 : index
    %c0_120 = arith.constant 0 : index
    %c0_121 = arith.constant 0 : index
    %172 = vector.load %arg11[%c0_119, %c0_120, %c0_121] : memref<1x32x32xf32, #tpu.memory_space<vmem>>, vector<1x32x32xf32>
    %173 = vector.shape_cast %172 : vector<1x32x32xf32> to vector<32x32xf32>
    %cst_122 = arith.constant dense<0.000000e+00> : vector<16x32xf32>
    %174 = tpu.matmul %171, %173, %cst_122 {dimension_numbers = #tpu.dot_dimension_numbers<[1], [0], [0], [1], [0, 0, 1, 1], [], []>} : vector<16x32xf32>, vector<32x32xf32>, vector<16x32xf32> -> vector<16x32xf32>
    %c0_123 = arith.constant 0 : index
    %c0_124 = arith.constant 0 : index
    %c0_125 = arith.constant 0 : index
    %175 = vector.load %arg12[%c0_123, %c0_124, %c0_125] : memref<1x1x32xf32, #tpu.memory_space<vmem>>, vector<1x1x32xf32>
    %176 = vector.shape_cast %175 : vector<1x1x32xf32> to vector<1x32xf32>
    %177 = vector.broadcast %176 : vector<1x32xf32> to vector<16x32xf32>
    %178 = arith.addf %174, %177 : vector<16x32xf32>
    %179 = arith.addf %178, %4 : vector<16x32xf32>
    %cst_126 = arith.constant dense<0.000000e+00> : vector<16xf32>
    %180 = vector.multi_reduction <add>, %179, %cst_126 [1] : vector<16x32xf32> to vector<16xf32>
    %181 = vector.shape_cast %180 : vector<16xf32> to vector<16x1xf32>
    %cst_127 = arith.constant 3.200000e+01 : f32
    %182 = vector.broadcast %cst_127 : f32 to vector<16x1xf32>
    %183 = arith.divf %181, %182 : vector<16x1xf32>
    %184 = vector.broadcast %183 : vector<16x1xf32> to vector<16x32xf32>
    %185 = arith.subf %179, %184 : vector<16x32xf32>
    %186 = arith.mulf %185, %185 : vector<16x32xf32>
    %cst_128 = arith.constant dense<0.000000e+00> : vector<16xf32>
    %187 = vector.multi_reduction <add>, %186, %cst_128 [1] : vector<16x32xf32> to vector<16xf32>
    %188 = vector.shape_cast %187 : vector<16xf32> to vector<16x1xf32>
    %cst_129 = arith.constant 3.200000e+01 : f32
    %189 = vector.broadcast %cst_129 : f32 to vector<16x1xf32>
    %190 = arith.divf %188, %189 : vector<16x1xf32>
    %191 = vector.broadcast %183 : vector<16x1xf32> to vector<16x32xf32>
    %192 = arith.subf %179, %191 : vector<16x32xf32>
    %cst_130 = arith.constant 9.99999974E-6 : f32
    %193 = vector.broadcast %cst_130 : f32 to vector<16x1xf32>
    %194 = arith.addf %190, %193 : vector<16x1xf32>
    %195 = math.rsqrt %194 : vector<16x1xf32>
    %196 = vector.broadcast %195 : vector<16x1xf32> to vector<16x32xf32>
    %197 = arith.mulf %192, %196 : vector<16x32xf32>
    %c0_131 = arith.constant 0 : index
    %c0_132 = arith.constant 0 : index
    %c0_133 = arith.constant 0 : index
    %198 = vector.load %arg13[%c0_131, %c0_132, %c0_133] : memref<1x1x32xf32, #tpu.memory_space<vmem>>, vector<1x1x32xf32>
    %199 = vector.shape_cast %198 : vector<1x1x32xf32> to vector<1x32xf32>
    %200 = vector.broadcast %199 : vector<1x32xf32> to vector<16x32xf32>
    %201 = arith.mulf %197, %200 : vector<16x32xf32>
    %c0_134 = arith.constant 0 : index
    %c0_135 = arith.constant 0 : index
    %c0_136 = arith.constant 0 : index
    %202 = vector.load %arg14[%c0_134, %c0_135, %c0_136] : memref<1x1x32xf32, #tpu.memory_space<vmem>>, vector<1x1x32xf32>
    %203 = vector.shape_cast %202 : vector<1x1x32xf32> to vector<1x32xf32>
    %204 = vector.broadcast %203 : vector<1x32xf32> to vector<16x32xf32>
    %205 = arith.addf %201, %204 : vector<16x32xf32>
    %206 = vector.shape_cast %205 : vector<16x32xf32> to vector<2x8x32xf32>
    %207 = vector.broadcast %6 : vector<2x8x1xf32> to vector<2x8x32xf32>
    %208 = arith.mulf %206, %207 : vector<2x8x32xf32>
    %209 = vector.shape_cast %208 : vector<2x8x32xf32> to vector<16x32xf32>
    %c0_137 = arith.constant 0 : index
    %c0_138 = arith.constant 0 : index
    %c0_139 = arith.constant 0 : index
    %210 = vector.load %arg15[%c0_137, %c0_138, %c0_139] : memref<1x32x64xf32, #tpu.memory_space<vmem>>, vector<1x32x64xf32>
    %211 = vector.shape_cast %210 : vector<1x32x64xf32> to vector<32x64xf32>
    %cst_140 = arith.constant dense<0.000000e+00> : vector<16x64xf32>
    %212 = tpu.matmul %209, %211, %cst_140 {dimension_numbers = #tpu.dot_dimension_numbers<[1], [0], [0], [1], [0, 0, 1, 1], [], []>} : vector<16x32xf32>, vector<32x64xf32>, vector<16x64xf32> -> vector<16x64xf32>
    %c0_141 = arith.constant 0 : index
    %c0_142 = arith.constant 0 : index
    %c0_143 = arith.constant 0 : index
    %213 = vector.load %arg16[%c0_141, %c0_142, %c0_143] : memref<1x1x64xf32, #tpu.memory_space<vmem>>, vector<1x1x64xf32>
    %214 = vector.shape_cast %213 : vector<1x1x64xf32> to vector<1x64xf32>
    %215 = vector.broadcast %214 : vector<1x64xf32> to vector<16x64xf32>
    %216 = arith.addf %212, %215 : vector<16x64xf32>
    %cst_144 = arith.constant 0.000000e+00 : f32
    %217 = vector.broadcast %cst_144 : f32 to vector<16x64xf32>
    %218 = arith.maximumf %216, %217 : vector<16x64xf32>
    %c0_145 = arith.constant 0 : index
    %c0_146 = arith.constant 0 : index
    %c0_147 = arith.constant 0 : index
    %219 = vector.load %arg17[%c0_145, %c0_146, %c0_147] : memref<1x64x32xf32, #tpu.memory_space<vmem>>, vector<1x64x32xf32>
    %220 = vector.shape_cast %219 : vector<1x64x32xf32> to vector<64x32xf32>
    %cst_148 = arith.constant dense<0.000000e+00> : vector<16x32xf32>
    %221 = tpu.matmul %218, %220, %cst_148 {dimension_numbers = #tpu.dot_dimension_numbers<[1], [0], [0], [1], [0, 0, 1, 1], [], []>} : vector<16x64xf32>, vector<64x32xf32>, vector<16x32xf32> -> vector<16x32xf32>
    %c0_149 = arith.constant 0 : index
    %c0_150 = arith.constant 0 : index
    %c0_151 = arith.constant 0 : index
    %222 = vector.load %arg18[%c0_149, %c0_150, %c0_151] : memref<1x1x32xf32, #tpu.memory_space<vmem>>, vector<1x1x32xf32>
    %223 = vector.shape_cast %222 : vector<1x1x32xf32> to vector<1x32xf32>
    %224 = vector.broadcast %223 : vector<1x32xf32> to vector<16x32xf32>
    %225 = arith.addf %221, %224 : vector<16x32xf32>
    %226 = arith.addf %225, %209 : vector<16x32xf32>
    %cst_152 = arith.constant dense<0.000000e+00> : vector<16xf32>
    %227 = vector.multi_reduction <add>, %226, %cst_152 [1] : vector<16x32xf32> to vector<16xf32>
    %228 = vector.shape_cast %227 : vector<16xf32> to vector<16x1xf32>
    %cst_153 = arith.constant 3.200000e+01 : f32
    %229 = vector.broadcast %cst_153 : f32 to vector<16x1xf32>
    %230 = arith.divf %228, %229 : vector<16x1xf32>
    %231 = vector.broadcast %230 : vector<16x1xf32> to vector<16x32xf32>
    %232 = arith.subf %226, %231 : vector<16x32xf32>
    %233 = arith.mulf %232, %232 : vector<16x32xf32>
    %cst_154 = arith.constant dense<0.000000e+00> : vector<16xf32>
    %234 = vector.multi_reduction <add>, %233, %cst_154 [1] : vector<16x32xf32> to vector<16xf32>
    %235 = vector.shape_cast %234 : vector<16xf32> to vector<16x1xf32>
    %cst_155 = arith.constant 3.200000e+01 : f32
    %236 = vector.broadcast %cst_155 : f32 to vector<16x1xf32>
    %237 = arith.divf %235, %236 : vector<16x1xf32>
    %238 = vector.broadcast %230 : vector<16x1xf32> to vector<16x32xf32>
    %239 = arith.subf %226, %238 : vector<16x32xf32>
    %cst_156 = arith.constant 9.99999974E-6 : f32
    %240 = vector.broadcast %cst_156 : f32 to vector<16x1xf32>
    %241 = arith.addf %237, %240 : vector<16x1xf32>
    %242 = math.rsqrt %241 : vector<16x1xf32>
    %243 = vector.broadcast %242 : vector<16x1xf32> to vector<16x32xf32>
    %244 = arith.mulf %239, %243 : vector<16x32xf32>
    %c0_157 = arith.constant 0 : index
    %c0_158 = arith.constant 0 : index
    %c0_159 = arith.constant 0 : index
    %245 = vector.load %arg19[%c0_157, %c0_158, %c0_159] : memref<1x1x32xf32, #tpu.memory_space<vmem>>, vector<1x1x32xf32>
    %246 = vector.shape_cast %245 : vector<1x1x32xf32> to vector<1x32xf32>
    %247 = vector.broadcast %246 : vector<1x32xf32> to vector<16x32xf32>
    %248 = arith.mulf %244, %247 : vector<16x32xf32>
    %c0_160 = arith.constant 0 : index
    %c0_161 = arith.constant 0 : index
    %c0_162 = arith.constant 0 : index
    %249 = vector.load %arg20[%c0_160, %c0_161, %c0_162] : memref<1x1x32xf32, #tpu.memory_space<vmem>>, vector<1x1x32xf32>
    %250 = vector.shape_cast %249 : vector<1x1x32xf32> to vector<1x32xf32>
    %251 = vector.broadcast %250 : vector<1x32xf32> to vector<16x32xf32>
    %252 = arith.addf %248, %251 : vector<16x32xf32>
    %253 = vector.shape_cast %252 : vector<16x32xf32> to vector<2x8x32xf32>
    %254 = vector.broadcast %6 : vector<2x8x1xf32> to vector<2x8x32xf32>
    %255 = arith.mulf %253, %254 : vector<2x8x32xf32>
    %c0_163 = arith.constant 0 : index
    %c0_164 = arith.constant 0 : index
    %c0_165 = arith.constant 0 : index
    %256 = vector.load %arg22[%c0_163, %c0_164, %c0_165] : memref<2x8x32xf32, #tpu.memory_space<vmem>>, vector<2x8x32xf32>
    tpu.vector_store %arg22[%c0_163, %c0_164, %c0_165], %255 {strides = array<i32>} : memref<2x8x32xf32, #tpu.memory_space<vmem>>, vector<2x8x32xf32>,
    %c1_i32 = arith.constant 1 : i32
    %257 = arith.cmpi eq, %arg1, %c1_i32 : i32
    %258 = arith.extui %257 : i1 to i32
    %c0_i32_166 = arith.constant 0 : i32
    %259 = arith.cmpi ne, %258, %c0_i32_166 : i32
    scf.if %259 {
      %c0_167 = arith.constant 0 : index
      %c0_168 = arith.constant 0 : index
      %c0_169 = arith.constant 0 : index
      %260 = vector.load %arg21[%c0_167, %c0_168, %c0_169] : memref<2x8x32xf32, #tpu.memory_space<vmem>>, vector<2x8x32xf32>
      tpu.vector_store %arg21[%c0_167, %c0_168, %c0_169], %255 {strides = array<i32>} : memref<2x8x32xf32, #tpu.memory_space<vmem>>, vector<2x8x32xf32>,
    } else {
    }
    return
  }
  func.func @transform_0(%arg0: i32, %arg1: i32) -> (i32, i32, i32) {
    %c0_i32 = arith.constant 0 : i32
    %c0_i32_0 = arith.constant 0 : i32
    %c0_i32_1 = arith.constant 0 : i32
    return %arg0, %c0_i32, %c0_i32_0 : i32, i32, i32
  }
  func.func @transform_1(%arg0: i32, %arg1: i32) -> (i32, i32, i32) {
    %c0_i32 = arith.constant 0 : i32
    %c0_i32_0 = arith.constant 0 : i32
    %c0_i32_1 = arith.constant 0 : i32
    return %arg0, %c0_i32, %c0_i32_0 : i32, i32, i32
  }
  func.func @transform_2(%arg0: i32, %arg1: i32) -> (i32, i32, i32) {
    %c0_i32 = arith.constant 0 : i32
    %c0_i32_0 = arith.constant 0 : i32
    %c0_i32_1 = arith.constant 0 : i32
    return %arg0, %c0_i32, %c0_i32_0 : i32, i32, i32
  }
  func.func @transform_3(%arg0: i32, %arg1: i32) -> (i32, i32, i32) {
    %c0_i32 = arith.constant 0 : i32
    %c0_i32_0 = arith.constant 0 : i32
    %c0_i32_1 = arith.constant 0 : i32
    return %arg1, %c0_i32, %c0_i32_0 : i32, i32, i32
  }
  func.func @transform_4(%arg0: i32, %arg1: i32) -> (i32, i32, i32) {
    %c0_i32 = arith.constant 0 : i32
    %c0_i32_0 = arith.constant 0 : i32
    %c0_i32_1 = arith.constant 0 : i32
    return %arg1, %c0_i32, %c0_i32_0 : i32, i32, i32
  }
  func.func @transform_5(%arg0: i32, %arg1: i32) -> (i32, i32, i32) {
    %c0_i32 = arith.constant 0 : i32
    %c0_i32_0 = arith.constant 0 : i32
    %c0_i32_1 = arith.constant 0 : i32
    return %arg1, %c0_i32, %c0_i32_0 : i32, i32, i32
  }
  func.func @transform_6(%arg0: i32, %arg1: i32) -> (i32, i32, i32) {
    %c0_i32 = arith.constant 0 : i32
    %c0_i32_0 = arith.constant 0 : i32
    %c0_i32_1 = arith.constant 0 : i32
    return %arg1, %c0_i32, %c0_i32_0 : i32, i32, i32
  }
  func.func @transform_7(%arg0: i32, %arg1: i32) -> (i32, i32, i32) {
    %c0_i32 = arith.constant 0 : i32
    %c0_i32_0 = arith.constant 0 : i32
    %c0_i32_1 = arith.constant 0 : i32
    return %arg1, %c0_i32, %c0_i32_0 : i32, i32, i32
  }
  func.func @transform_8(%arg0: i32, %arg1: i32) -> (i32, i32, i32) {
    %c0_i32 = arith.constant 0 : i32
    %c0_i32_0 = arith.constant 0 : i32
    %c0_i32_1 = arith.constant 0 : i32
    return %arg1, %c0_i32, %c0_i32_0 : i32, i32, i32
  }
  func.func @transform_9(%arg0: i32, %arg1: i32) -> (i32, i32, i32) {
    %c0_i32 = arith.constant 0 : i32
    %c0_i32_0 = arith.constant 0 : i32
    %c0_i32_1 = arith.constant 0 : i32
    return %arg1, %c0_i32, %c0_i32_0 : i32, i32, i32
  }
  func.func @transform_10(%arg0: i32, %arg1: i32) -> (i32, i32, i32) {
    %c0_i32 = arith.constant 0 : i32
    %c0_i32_0 = arith.constant 0 : i32
    %c0_i32_1 = arith.constant 0 : i32
    return %arg1, %c0_i32, %c0_i32_0 : i32, i32, i32
  }
  func.func @transform_11(%arg0: i32, %arg1: i32) -> (i32, i32, i32) {
    %c0_i32 = arith.constant 0 : i32
    %c0_i32_0 = arith.constant 0 : i32
    %c0_i32_1 = arith.constant 0 : i32
    return %arg1, %c0_i32, %c0_i32_0 : i32, i32, i32
  }
  func.func @transform_12(%arg0: i32, %arg1: i32) -> (i32, i32, i32) {
    %c0_i32 = arith.constant 0 : i32
    %c0_i32_0 = arith.constant 0 : i32
    %c0_i32_1 = arith.constant 0 : i32
    return %arg1, %c0_i32, %c0_i32_0 : i32, i32, i32
  }
  func.func @transform_13(%arg0: i32, %arg1: i32) -> (i32, i32, i32) {
    %c0_i32 = arith.constant 0 : i32
    %c0_i32_0 = arith.constant 0 : i32
    %c0_i32_1 = arith.constant 0 : i32
    return %arg1, %c0_i32, %c0_i32_0 : i32, i32, i32
  }
  func.func @transform_14(%arg0: i32, %arg1: i32) -> (i32, i32, i32) {
    %c0_i32 = arith.constant 0 : i32
    %c0_i32_0 = arith.constant 0 : i32
    %c0_i32_1 = arith.constant 0 : i32
    return %arg1, %c0_i32, %c0_i32_0 : i32, i32, i32
  }
  func.func @transform_15(%arg0: i32, %arg1: i32) -> (i32, i32, i32) {
    %c0_i32 = arith.constant 0 : i32
    %c0_i32_0 = arith.constant 0 : i32
    %c0_i32_1 = arith.constant 0 : i32
    return %arg1, %c0_i32, %c0_i32_0 : i32, i32, i32
  }
  func.func @transform_16(%arg0: i32, %arg1: i32) -> (i32, i32, i32) {
    %c0_i32 = arith.constant 0 : i32
    %c0_i32_0 = arith.constant 0 : i32
    %c0_i32_1 = arith.constant 0 : i32
    return %arg1, %c0_i32, %c0_i32_0 : i32, i32, i32
  }
  func.func @transform_17(%arg0: i32, %arg1: i32) -> (i32, i32, i32) {
    %c0_i32 = arith.constant 0 : i32
    %c0_i32_0 = arith.constant 0 : i32
    %c0_i32_1 = arith.constant 0 : i32
    return %arg1, %c0_i32, %c0_i32_0 : i32, i32, i32
  }
  func.func @transform_18(%arg0: i32, %arg1: i32) -> (i32, i32, i32) {
    %c0_i32 = arith.constant 0 : i32
    %c0_i32_0 = arith.constant 0 : i32
    %c0_i32_1 = arith.constant 0 : i32
    return %arg1, %c0_i32, %c0_i32_0 : i32, i32, i32
  }
  func.func @transform_19(%arg0: i32, %arg1: i32) -> (i32, i32, i32) {
    %c0_i32 = arith.constant 0 : i32
    %c0_i32_0 = arith.constant 0 : i32
    %c0_i32_1 = arith.constant 0 : i32
    return %arg0, %c0_i32, %c0_i32_0 : i32, i32, i32
  }
}

</mosaic_0001>

<bundles_post_ra>
// kernel: tpu_custom_call.1
= control target key start
LH: loop header
LB: loop body
LE: loop exit
PB: predicated region body
PF: predicated region fallthrough
CT: control target
= control target key end

     0   :  { %s5703_s0 = inlined_call_operand.vmem [shape: f32[2,1,8], index: 0, kind: input, shape index: {}]   ;;  %s5704_s1 = inlined_call_operand.vmem [shape: f32[2,8,1], index: 1, kind: input, shape index: {}]   ;;  %s5705_s2 = inlined_call_operand.vmem [shape: f32[2,8,32], index: 2, kind: input, shape index: {}]   ;;  %s5706_s3 = inlined_call_operand.vmem [shape: f32[2,32,32], index: 3, kind: input, shape index: {}]   ;;  %s5707_s4 = inlined_call_operand.vmem [shape: f32[2,1,32], index: 4, kind: input, shape index: {}]   ;;  %s5708_s5 = inlined_call_operand.vmem [shape: f32[2,32,32], index: 5, kind: input, shape index: {}]   ;;  %s5709_s6 = inlined_call_operand.vmem [shape: f32[2,1,32], index: 6, kind: input, shape index: {}]   ;;  %s5710_s7 = inlined_call_operand.vmem [shape: f32[2,32,32], index: 7, kind: input, shape index: {}]   ;;  %s5711_s8 = inlined_call_operand.vmem [shape: f32[2,1,32], index: 8, kind: input, shape index: {}]   ;;  %s5712_s9 = inlined_call_operand.hbm [shape: f32[2,32,32], index: 9, kind: input, shape index: {}]   ;;  %s5713_s10 = inlined_call_operand.vmem [shape: f32[2,1,32], index: 10, kind: input, shape index: {}]   ;;  %s5714_s11 = inlined_call_operand.vmem [shape: f32[2,1,32], index: 11, kind: input, shape index: {}]   ;;  %s5715_s12 = inlined_call_operand.vmem [shape: f32[2,1,32], index: 12, kind: input, shape index: {}]   ;;  %s5716_s13 = inlined_call_operand.hbm [shape: f32[2,32,64], index: 13, kind: input, shape index: {}]   ;;  %s5717_s14 = inlined_call_operand.vmem [shape: f32[2,1,64], index: 14, kind: input, shape index: {}]   ;;  %s5718_s15 = inlined_call_operand.vmem [shape: f32[2,64,32], index: 15, kind: input, shape index: {}]   ;;  %s5719_s16 = inlined_call_operand.vmem [shape: f32[2,1,32], index: 16, kind: input, shape index: {}]   ;;  %s5720_s17 = inlined_call_operand.vmem [shape: f32[2,1,32], index: 17, kind: input, shape index: {}]   ;;  %s5721_s18 = inlined_call_operand.vmem [shape: f32[2,1,32], index: 18, kind: input, shape index: {}]   ;;  %s5722_s19 = inlined_call_operand.hbm [shape: f32[2,8,32], index: 19, kind: output, shape index: {}]  }
   0x1   :  { %5734 = sst [smem:[#allocation20_spill]] %s5703_s0 }
   0x2   :  { %5735 = sst [smem:[#allocation21_spill]] %s5704_s1 }
   0x3   :  { %5736 = sst [smem:[#allocation22_spill]] %s5705_s2 }
   0x4   :  { %5737 = sst [smem:[#allocation23_spill]] %s5706_s3 }
   0x5   :  { %5738 = sst [smem:[#allocation24_spill]] %s5708_s5 }
   0x6   :  { %5739 = sst [smem:[#allocation25_spill]] %s5710_s7 }
   0x7   :  { %5740 = sst [smem:[#allocation26_spill]] %s5712_s9 }
   0x8   :  { %5741 = sst [smem:[#allocation27_spill]] %s5714_s11 }
   0x9   :  { %5742 = sst [smem:[#allocation28_spill]] %s5715_s12 }
   0xa   :  { %5743 = sst [smem:[#allocation29_spill]] %s5716_s13 }
   0xb   :  { %5744 = sst [smem:[#allocation30_spill]] %s5717_s14 }
   0xc   :  { %5745 = sst [smem:[#allocation31_spill]] %s5718_s15 }
   0xd   :  { %5746 = sst [smem:[#allocation32_spill]] %s5719_s16 }
   0xe   :  { %5747 = sst [smem:[#allocation33_spill]] %s5720_s17 }
   0xf   :  { %5748 = sst [smem:[#allocation34_spill]] %s5721_s18 }
  0x10   :  { %5749 = sst [smem:[#allocation35_spill]] %s5722_s19 }
  0x11   :  { %24 = vsyncpa [#allocation5], 0 }
  0x12   :  { %26 = vsyncpa [#allocation5 + $0x1], 0 }
  0x13   :  { %27 = vsyncpa [#allocation8], 0 }
  0x14   :  { %29 = vsyncpa [#allocation8 + $0x1], 0 }
  0x15   :  { %30 = vsyncpa [#allocation6], 0  ;;  %s5053_s0 = smov 0   ;;  %s5055_s30 = smov 0  }
  0x16   :  { %s5057_s20 = smov 0   ;;  %s5059_s21 = smov 0  }
  0x17   :  { %s5061_s1 = smov 0   ;;  %s5063_s22 = smov 0  }
  0x18 LB: > { %5750 = sst [smem:[#allocation13_spill]] %s4920_s30  ;;  %s5727_s2 = sadd.s32 4294967295, %s4936_s22   ;;  %s4936_s22 = sphi %s5063_s22, %s36_s22   ;;  %s4932_s1 = sphi %s5061_s1, %s5800_s1   ;;  %s4928_s21 = sphi %s5059_s21, %s5799_s21   ;;  %s4924_s20 = sphi %s5057_s20, %s5798_s20   ;;  %s4920_s30 = sphi %s5055_s30, %s5797_s30   ;;  %s4916_s0 = sphi %s5053_s0, %s5796_s0  }
  0x19   : > { %5751 = sst [smem:[#allocation14_spill]] %s4924_s20  ;;  %s45_s23 = sadd.s32 1, %s4932_s1 }
  0x1a   : > { %5752 = sst [smem:[#allocation15_spill]] %s4932_s1  ;;  %p46_p0 = scmp.ge.s32.totalorder %s45_s23, 2 }
  0x1b   : > { %5753 = sst [smem:[#allocation16_spill]] %s4936_s22  ;;  %s289_s24 = sadd.s32 1, %s4924_s20 }
  0x1c   : > { %p296_p1 = scmp.ne.s32.totalorder %s4924_s20, %s4920_s30  ;;  %p297_p2 = scmp.eq.s32.totalorder %s4936_s22, 0 }
  0x1d   : > { %s5802_s23 = smov (%p46_p0, %s45_s23), 0  ;;  %p302_p4 = scmp.ne.s32.totalorder %s4920_s30, %s4916_s0 }
  0x1e   : > { %5754 = sst [smem:[#allocation17_spill]] %s5802_s23  ;;  %p5089_p3 = por %p297_p2, %p296_p1 }
  0x1f   : > { %s286_s3 = ssub.s32 %s4932_s1, %s5802_s23  ;;  %p303_p5 = scmp.eq.s32.totalorder %s5727_s2, 0 }
  0x20   : > { %p287_p6 = scmp.eq.s32.totalorder %s286_s3, 0  ;;  %p4690_p8 = scmp.lt.s32.totalorder %s4936_s22, 2 }
  0x21   : > { %p5098_p7 = por %p303_p5, %p302_p4  ;;  %s5107_s28 = sand.u32 1, %s4924_s20  }
  0x22   : > { %s5104_s27 = scalar_select %p287_p6, %s4924_s20, %s289_s24  }
  0x23   : > { %s5728_s29 = sshll.u32 %s4932_s1, 9  ;;  %s4192_s19 = sshll.u32 %s5107_s28, 5 }
  0x24   : > { %5757 = sst [smem:[#allocation18_spill]] %s5104_s27  ;;  %s658_s2 = scalar_lea.vmem [#allocation4], %s4192_s19 }
  0x25   : > { %s5758_s9 = sld [smem:[#allocation26_spill]]  ;;  %s665_s3 = sshll.u32 %s658_s2, 4  ;;  %s666_s3 = int_to_ptr.vmem [resolvable:$true] %s665_s3 }
  0x26   : > { %p5118_p9 = pnand %p4690_p8, %p5089_p3  ;;  %s655_s24 = scalar_lea.sflag [#allocation5], %s5107_s28 }
  0x27   : > { %s4811_s27 = scalar_lea.vmem %s666_s3, 512  ;;  %s4938_s18 = smov [#allocation4]  }
  0x28   : > { %p4800_p10 = pneg %p5118_p9  ;;  %p4812_p11 = scmp.ne.s32.totalorder %s666_s3, %s4811_s27 }
  0x29   : > { %s4816_s0 = sshll.u32 %s4938_s18, 4  ;;  %s4817_s0 = int_to_ptr.vmem [resolvable:$false] %s4816_s0 }
  0x2a   : > { %p4814_p12 = pnand %p4812_p11, %p4800_p10  ;;  %s4818_s2 = scalar_lea.vmem %s4817_s0, 1024 }
  0x2b   : > { %s664_s23 = scalar_lea.hbm %s5758_s9, %s5728_s29  ;;  %p4819_p0 = scmp.lt.s32.totalorder %s666_s3, %s4817_s0 }
  0x2c   : > { %p4815_p13 = pneg %p4814_p12  ;;  %p4820_p1 = scmp.lt.s32.totalorder %s4818_s2, %s4811_s27 }
  0x2e   : > { %p4821_p2 = por %p4820_p1, %p4819_p0 }
  0x30   : > { %p4822_p3 = pnand %p4821_p2, %p4815_p13 }
  0x32   : > { %4825 = shalt.err (!%p4822_p3)
}
  0x33   : > { %s4939_s25 = smov 128   ;;  %s4940_s29 = smov 8  }
  0x34   : > { %4686 = dma.hbm_to_vmem [thread:$0]  (!%p5118_p9), %s664_s23, 512, %s666_s3, %s655_s24, %s4939_s25, %s4939_s25, %s4940_s29  }
  0x35   : > { %p4198_p4 = scmp.ge.s32.totalorder %s4936_s22, 1  ;;  %p744_p5 = scmp.lt.s32.totalorder %s4936_s22, 3 }
  0x36   : > { %s5761_s27 = sshll.u32 %s4932_s1, 9  ;;  %s5762_s13 = sld [smem:[#allocation29_spill]] }
  0x37   : > { %p5132_p6 = pnand %p4198_p4, %p744_p5  ;;  %s697_s20 = scalar_lea.vmem [#allocation7], %s4192_s19 }
  0x38   : > { %s704_s16 = sshll.u32 %s697_s20, 4  ;;  %s694_s15 = scalar_lea.sflag [#allocation8], %s5107_s28  ;;  %s705_s16 = int_to_ptr.vmem [resolvable:$true] %s704_s16 }
  0x39   : > { %s4839_s14 = scalar_lea.vmem %s705_s16, 512  ;;  %s4941_s23 = smov [#allocation7]  }
  0x3a   : > { %p4840_p8 = scmp.ne.s32.totalorder %s705_s16, %s4839_s14  ;;  %s4844_s3 = sshll.u32 %s4941_s23, 4  ;;  %s4845_s3 = int_to_ptr.vmem [resolvable:$false] %s4844_s3 }
  0x3b   : > { %s4846_s24 = scalar_lea.vmem %s4845_s3, 1024  ;;  %p4847_p13 = scmp.lt.s32.totalorder %s705_s16, %s4845_s3 }
  0x3c   : > { %s703_s9 = scalar_lea.hbm %s5762_s13, %s5761_s27  ;;  %p4842_p11 = pnand %p4840_p8, %p4800_p10 }
  0x3d   : > { %p4848_p0 = scmp.lt.s32.totalorder %s4846_s24, %s4839_s14 }
  0x3e   : > { %p4843_p12 = pneg %p4842_p11 }
  0x3f   : > { %p4849_p1 = por %p4848_p0, %p4847_p13 }
  0x41   : > { %p4850_p2 = pnand %p4849_p1, %p4843_p12 }
  0x43   : > { %4853 = shalt.err (!%p4850_p2)
}
  0x44   : > { %4689 = dma.hbm_to_vmem [thread:$0]  (!%p5118_p9), %s703_s9, 512, %s705_s16, %s694_s15, %s4939_s25, %s4939_s25, %s4940_s29  }
  0x45   : > { %748 = sbr.rel (%p5132_p6) target bundleno = 4571 (0x11db), region = 96 }
  0x4a   : > { %s750_s19 = sand.u32 1, %s4920_s30  }
  0x4b   : > { %s4199_s20 = sshll.u32 %s750_s19, 5  ;;  %s751_s28 = scalar_lea.sflag [#allocation5], %s750_s19 }
  0x4c   : > { %s5150_s27 = scalar_lea.vmem [#allocation4], %s4199_s20 }
  0x4d   : > { %4903 = dma.done.wait (%p5098_p7), %s751_s28, 512  }
  0x4e   : > { %4905 = vsyncadd (%p5098_p7), %s751_s28, 4294966784  ;;  %s760_s14 = scalar_lea.sflag [#allocation8], %s750_s19  ;;  %s5156_s0 = scalar_lea.vmem [#allocation7], %s4199_s20 }
  0x4f   : > { %5763 = sst [smem:[#allocation19_spill]] %s5156_s0 }
  0x50   : > { %4907 = dma.done.wait (%p5098_p7), %s760_s14, 512  }
  0x51   : > { %4909 = vsyncadd (%p5098_p7), %s760_s14, 4294966784  ;;  %p899_p9 = scmp.lt.s32.totalorder %s4928_s21, 1  ;;  %s5764_s18 = sld [smem:[#allocation23_spill]] }
  0x52   : > { %s5765_s5 = sld [smem:[#allocation24_spill]]  ;;  %p4209_p7 = scmp.ne.s32.totalorder %s4928_s21, 0 }
  0x53   : > { %s5164_s9 = scalar_select %p899_p9, %s4928_s21, 1 }
  0x54   : > { %s5766_s7 = sld [smem:[#allocation25_spill]] }
  0x55   : > { %s4292_s15 = sshll.u32 %s5164_s9, 5  ;;  %s5770_s17 = sld [smem:[#allocation31_spill]] }
  0x56   : > { %s5771_s26 = sld [smem:[#allocation32_spill]] }
  0x57   : > { %s5174_s2 = scalar_lea.vmem %s5764_s18, %s4292_s15  ;;  %s5773_s20 = sld [smem:[#allocation34_spill]] }
  0x58   : > { %s5179_s24 = scalar_lea.vmem %s5765_s5, %s4292_s15  ;;  %s5772_s5 = sld [smem:[#allocation33_spill]] }
  0x59   : > { %s5774_s22 = sld [smem:[#allocation22_spill]] (!%p4209_p7) }
  0x5a   : > { %s5188_s1 = scalar_lea.vmem %s5766_s7, %s4292_s15  ;;  %s5769_s15 = sld [smem:[#allocation30_spill]] }
  0x5b   : > { %s4295_s7 = sshll.u32 %s5164_s9, 6 }
  0x5c   : > { %s5214_s29 = scalar_lea.vmem %s5770_s17, %s4295_s7  ;;  %s942_s0 = scalar_lea.vmem %s5771_s26, %s5164_s9 }
  0x5d   : > { %s948_s12 = scalar_lea.vmem %s5773_s20, %s5164_s9  ;;  %953 = sbr.rel (%p4209_p7) target bundleno = 100 (0x64), region = 108 }
  0x5e   : > { %s945_s11 = scalar_lea.vmem %s5772_s5, %s5164_s9 }
  0x60   : > { %s934_s14 = scalar_lea.vmem %s5769_s15, %s5164_s9  ;;  %s5775_s15 = smov (!%p4209_p7), %s5774_s22 }
  0x62   : > { %v954_v0 = vld [vmem:[%s5774_s22] sm:$0xff]  ;;  %vm956_vm0 = vcmask 261120   ;;  %v955_v1 = vld [vmem:[%s5775_s15 + $0x8] sm:$0xff] }
  0x63   : > { %957 = vst.msk [vmem:[#allocation2] sm:$0xff] %vm956_vm0, %v954_v0  ;;  %958 = vst.msk [vmem:[#allocation2 + $0x8] sm:$0xff] %vm956_vm0, %v955_v1 }
  0x64 PF: > { %v5236_v2 = vld [vmem:[%s5174_s2 + $0x18] sm:$0xff]  ;;  %v5239_v3 = vld [vmem:[%s5174_s2 + $0x10] sm:$0xff]  ;;  %vm976_vm1 = vcmask 261120   ;;  %v5246_v5 = vld [vmem:[%s5174_s2 + $0x8] sm:$0xff]  ;;  %v4942_v12 = vmov 0.0   ;;  %vm4943_vm2 = vmmov 0   ;;  %s5777_s17 = scalar_lea.vmem %s5707_s4, %s5164_s9  ;;  %s5779_s13 = scalar_lea.vmem %s5711_s8, %s5164_s9 }
  0x65   : > { %4422 = vmatprep.subr.mxu1 %v5236_v2  ;;  %v5255_v6 = vld [vmem:[%s5174_s2] sm:$0xff]  ;;  %v5262_v8 = vld [vmem:[%s5179_s24 + $0x18] sm:$0xff]  ;;  %v5267_v9 = vld [vmem:[%s5179_s24 + $0x10] sm:$0xff]  ;;  %s5776_s2 = scalar_lea.vmem %s5709_s6, %s5164_s9  ;;  %vm1230_vm3 = vcmask 64512   ;;  %s4944_s25 = smov 120   ;;  %vm2213_vm4 = vcmask 130112  }
  0x66   : > { %4423 = vmatpush3.msra.mxu1 %v5236_v2  ;;  %v5274_v10 = vld [vmem:[%s5179_s24 + $0x8] sm:$0xff]  ;;  %v5281_v11 = vld [vmem:[%s5179_s24] sm:$0xff]  ;;  %v5321_v23 = vld [vmem:[%s5188_s1 + $0x18] sm:$0xff]  ;;  %1691 = vrot.lane.b32.xlu1 %v5267_v9, %s4944_s25  ;;  %s5778_s23 = sld [smem:[#allocation20_spill]]  ;;  %s4945_s22 = smov 112   ;;  %vm2860_vm5 = vcmask 195712  }
  0x67   : > { %4424 = vmatprep.subr.mxu1 %v5239_v3  ;;  %v5297_v16 = vld [vmem:[%s5776_s2] ss:$0 sm:$0xff]  ;;  %v5324_v24 = vld [vmem:[%s5188_s1 + $0x10] sm:$0xff]  ;;  %4444 = vmatprep.subr.mxu0 %v5321_v23  ;;  %v5331_v25 = vld [vmem:[%s5188_s1 + $0x8] sm:$0xff]  ;;  %s4946_s7 = smov 104   ;;  %s4947_s16 = smov 8  }
  0x68   : > { %4425 = vmatpush3.msra.mxu1 %v5239_v3  ;;  %v5304_v18 = vld [vmem:[%s5777_s17] ss:$0 sm:$0xff]  ;;  %4445 = vmatpush3.msra.mxu0 %v5321_v23  ;;  %s4948_s5 = smov 16   ;;  %s4949_s26 = smov 24   ;;  %vm3507_vm6 = vcmask 261312   ;;  %vm3772_vm7 = vcmask 523264  }
  0x69   : > { %4426 = vmatprep.subr.mxu1 %v5246_v5  ;;  %4446 = vmatprep.subr.mxu0 %v5324_v24  ;;  %v5336_v26 = vld [vmem:[%s5188_s1] sm:$0xff]  ;;  %s5780_s24 = scalar_lea.vmem %s5713_s10, %s5164_s9  ;;  %s5782_s1 = sld [smem:[#allocation19_spill]] }
  0x6a   : > { %v5242_v4 = vld [vmem:[#allocation2] sm:$0xff]  ;;  %4427 = vmatpush3.msra.mxu1 %v5246_v5  ;;  %v5259_v7 = vld [vmem:[#allocation2 + $0x8] sm:$0xff]  ;;  %4447 = vmatpush3.msra.mxu0 %v5324_v24  ;;  %s5783_s28 = sld [smem:[#allocation27_spill]]  ;;  %p4285_p10 = scmp.ne.s32.totalorder %s4928_s21, 1 }
  0x6b   : > { %4430 = vmatprep.mubr.msk.f32.mxu1 %vm976_vm1, %v5242_v4  ;;  %4452 = vmatprep.mubr.msk.f32.mxu0 %vm976_vm1, %v5242_v4  ;;  %v5384_v41 = vld [vmem:[%s5779_s13] ss:$0 sm:$0xff] }
  0x6c   : > { %4428 = vmatprep.subr.mxu1 %v5255_v6  ;;  %4448 = vmatprep.subr.mxu0 %v5331_v25  ;;  %v5356_v30 = vld [vmem:[%s5778_s23 + $0x1] ss:$0 sm:$0xff]  ;;  %v5361_v34 = vld [vmem:[%s5778_s23] ss:$0 sm:$0xff] }
  0x6d   : > { %4429 = vmatpush3.msra.mxu1 %v5255_v6  ;;  %1589 = vrot.lane.b32.xlu1 %v5236_v2, %s4944_s25 }
  0x6e   : > { %4431 = vmatmul.mubr.msk.f32.vlgmr.msra.gmra.mxu1 %vm976_vm1, %v5259_v7  ;;  %4433 = vmatprep.subr.mxu1 %v5262_v8 }
  0x6f   : > { %4434 = vmatpush3.msra.mxu1 %v5262_v8  ;;  %4441 = vmatprep.mubr.msk.f32.mxu1 %vm976_vm1, %v5242_v4 }
  0x70   : > { %4435 = vmatprep.subr.mxu1 %v5267_v9  ;;  %4449 = vmatpush3.msra.mxu0 %v5331_v25  ;;  %s5784_s13 = scalar_lea.vmem %s5783_s28, %s5164_s9 }
  0x71   : > { %4436 = vmatpush3.msra.mxu1 %v5267_v9  ;;  %4450 = vmatprep.subr.mxu0 %v5336_v26 }
  0x72   : > { %4437 = vmatprep.subr.mxu1 %v5274_v10  ;;  %4451 = vmatpush3.msra.mxu0 %v5336_v26 }
  0x73   : > { %4438 = vmatpush3.msra.mxu1 %v5274_v10  ;;  %4453 = vmatmul.mubr.msk.f32.vlgmr.msra.gmra.mxu0 %vm976_vm1, %v5259_v7 }
  0x74   : > { %4439 = vmatprep.subr.mxu1 %v5281_v11  ;;  %1689 = vrot.lane.b32.xlu1 %v5274_v10, %s4944_s25 }
  0x75   : > { %4440 = vmatpush3.msra.mxu1 %v5281_v11  ;;  %4465 = vmatprep.subr.mxu0 %v4942_v12 }
  0x76   : > { %4442 = vmatmul.mubr.msk.f32.vlgmr.msra.gmra.mxu1 %vm976_vm1, %v5259_v7  ;;  %4455 = vmatprep.subr.mxu1 %v4942_v12 }
  0x77   : > { %4457 = vmatprep.mubr.msk.f32.mxu1 %vm4943_vm2, %v4942_v12  ;;  %4467 = vmatprep.mubr.msk.f32.mxu0 %vm4943_vm2, %v4942_v12 }
  0x78   : > { %1687 = vrot.lane.b32.xlu1 %v5281_v11, %s4944_s25 }
  0xd8   : > { %v1692_v39 = vpop.permute.xlu1 %1691 }
  0xdf   : > { %v1590_v45 = vpop.permute.xlu1 %1589 }
  0xe6   : > { %v1690_v57 = vpop.permute.xlu1 %1689 }
  0xea   : > { %v1688_v58 = vpop.permute.xlu1 %1687 }
 0x12e   : > { %v4432_v13 = vpop.f32.mrf.mxu1 }
 0x12f   : > { %v1055_v22 = vadd.f32 %v4432_v13, %v5304_v18 }
 0x130   : > { %v1049_v14 = vpop.f32.mrf.mxu1 }
 0x131   : > { %v1050_v20 = vadd.f32 %v5304_v18, %v1049_v14 }
 0x133   : > { %v4454_v40 = vpop.f32.mrf.mxu0 }
 0x134   : > { %v1227_v42 = vadd.f32 %v4454_v40, %v5384_v41 }
 0x135   : > { %v1221_v43 = vpop.f32.mrf.mxu0 }
 0x136   : > { %v4443_v15 = vpop.f32.mrf.mxu1  ;;  %v1222_v44 = vadd.f32 %v5384_v41, %v1221_v43 }
 0x137   : > { %v1141_v21 = vadd.f32 %v4443_v15, %v5297_v16 }
 0x138   : > { %v1135_v17 = vpop.f32.mrf.mxu1  ;;  %4466 = vmatpush3.msra.mxu0 %v1222_v44 }
 0x139   : > { %v1136_v19 = vadd.f32 %v5297_v16, %v1135_v17  ;;  %4475 = vmatprep.subr.mxu0 %v1590_v45 }
 0x13b   : > { %4456 = vmatpush3.xpose.msk.msra.mxu1 %vm1230_vm3, %v1136_v19 }
 0x13c   : > { %4460 = vmatprep.subr.mxu1 %v4942_v12 }
 0x13e   : > { %4458 = vmatmul.mubr.msk.f32.vlgmr.msra.gmra.mxu1 %vm1230_vm3, %v1050_v20 }
 0x13f   : > { %4461 = vmatpush3.xpose.msk.msra.mxu1 %vm1230_vm3, %v1141_v21  ;;  %4462 = vmatprep.mubr.msk.f32.mxu1 %vm4943_vm2, %v4942_v12 }
 0x140   : > { %4470 = vmatprep.subr.mxu1 %v4942_v12 }
 0x142   : > { %4463 = vmatmul.mubr.msk.f32.vlgmr.msra.gmra.mxu1 %vm1230_vm3, %v1055_v22 }
 0x143   : > { %4472 = vmatprep.mubr.msk.f32.mxu1 %vm4943_vm2, %v4942_v12  ;;  %4471 = vmatpush3.msra.mxu1 %v1227_v42 }
 0x1fe   : > { %v1303_v27 = vpop.f32.mrf.mxu1 }
 0x1ff   : > { %v1383_v31 = vmul.f32 0.35355338, %v1303_v27 }
 0x200   : > { %v4459_v28 = vpop.f32.mrf.mxu1 }
 0x201   : > { %v1397_v37 = vadd.f32 %v5361_v34, %v1383_v31 }
 0x202   : > { %v1379_v29 = vpop.f32.mrf.mxu1 }
 0x203   : > { %v1384_v32 = vmul.f32 0.35355338, %v1379_v29  ;;  %v1399_v38 = vsel %vm1230_vm3, %v1397_v37, -inf }
 0x204   : > { %v4464_v33 = vpop.f32.mrf.mxu1 }
 0x205   : > { %v1398_v35 = vadd.f32 %v5356_v30, %v1384_v32 }
 0x207   : > { %v1402_v36 = vsel %vm1230_vm3, %v1398_v35, -inf }
 0x208   : > { %1403 = vmax.xlane.f32.xlu0 %v1402_v36 }
 0x20c   : > { %1400 = vmax.xlane.f32.xlu0 %v1399_v38 }
 0x222   : > { %1693 = vrot.lane.b32.xlu0 %v5262_v8, %s4944_s25 }
 0x226   : > { %1587 = vrot.lane.b32.xlu0 %v5239_v3, %s4944_s25 }
 0x22a   : > { %1585 = vrot.lane.b32.xlu0 %v5246_v5, %s4944_s25 }
 0x22e   : > { %1699 = vrot.lane.b32.xlu0 %v5297_v16, %s4944_s25 }
 0x232   : > { %1797 = vrot.lane.b32.xlu0 %v5321_v23, %s4944_s25 }
 0x236   : > { %1793 = vrot.lane.b32.xlu0 %v5331_v25, %s4944_s25 }
 0x291   : > { %v1404_v46 = vpop.xlane.xlu0 %1403 }
 0x292   : > { %v1406_v47 = vsub.f32 %v1398_v35, %v1404_v46 }
 0x294   : > { %v1409_v50 = vmul.f32 1.442695, %v1406_v47 }
 0x295   : > { %v1401_v48 = vpop.xlane.xlu0 %1400 }
 0x296   : > { %v1405_v49 = vsub.f32 %v1397_v37, %v1401_v48 }
 0x298   : > { %v1407_v51 = vmul.f32 1.442695, %v1405_v49 }
 0x299   : > { %v1694_v56 = vpop.permute.xlu0 %1693 }
 0x29a   : > { %4756 = vpow2.f32 %v1407_v51  ;;  %4486 = vmatprep.subr.mxu1 %v1694_v56 }
 0x29b   : > { %4758 = vpow2.f32 %v1409_v50 }
 0x29d   : > { %v1588_v61 = vpop.permute.xlu0 %1587 }
 0x2a1   : > { %v1586_v1 = vpop.permute.xlu0 %1585 }
 0x2a5   : > { %v1700_v27 = vpop.permute.xlu0 %1699 }
 0x2a7   : > { %v4757_v52 = vpop.eup %4756 }
 0x2a8   : > { %v1411_v53 = vsel %vm1230_vm3, %v4757_v52, 0.0  ;;  %v4759_v54 = vpop.eup %4758 }
 0x2a9   : > { %1412 = vadd.xlane.f32.xlu1 %v1411_v53  ;;  %v1414_v55 = vsel %vm1230_vm3, %v4759_v54, 0.0  ;;  %v1798_v37 = vpop.permute.xlu0 %1797 }
 0x2ad   : > { %1415 = vadd.xlane.f32.xlu1 %v1414_v55 }
 0x2be   : > { %1583 = vrot.lane.b32.xlu1 %v5255_v6, %s4944_s25 }
 0x2c2   : > { %1595 = vrot.lane.b32.xlu1 %v5304_v18, %s4944_s25 }
 0x2c6   : > { %1795 = vrot.lane.b32.xlu1 %v5324_v24, %s4944_s25 }
 0x2ca   : > { %1791 = vrot.lane.b32.xlu1 %v5336_v26, %s4944_s25 }
 0x332   : > { %v1413_v59 = vpop.xlane.xlu1 %1412 }
 0x333   : > { %4760 = vrcp.f32 %v1413_v59 }
 0x336   : > { %v1416_v60 = vpop.xlane.xlu1 %1415 }
 0x337   : > { %4762 = vrcp.f32 %v1416_v60 }
 0x33a   : > { %v1584_v14 = vpop.permute.xlu1 %1583 }
 0x33e   : > { %v1596_v31 = vpop.permute.xlu1 %1595 }
 0x340   : > { %v4761_v62 = vpop.eup %4760 }
 0x341   : > { %v1418_v63 = vmul.f32 %v4761_v62, %v4757_v52 }
 0x342   : > { %v1796_v38 = vpop.permute.xlu1 %1795 }
 0x343   : > { %4468 = vmatmul.mubr.msk.f32.vlgmr.msra.gmra.mxu0 %vm1230_vm3, %v1418_v63 }
 0x344   : > { %v4763_v0 = vpop.eup %4762  ;;  %4476 = vmatpush3.msra.mxu0 %v1590_v45  ;;  %4483 = vmatprep.mubr.msk.f32.mxu0 %vm976_vm1, %v5242_v4 }
 0x345   : > { %v1420_v13 = vmul.f32 %v4763_v0, %v4759_v54  ;;  %4477 = vmatprep.subr.mxu0 %v1588_v61 }
 0x346   : > { %4478 = vmatpush3.msra.mxu0 %v1588_v61  ;;  %v1792_v40 = vpop.permute.xlu1 %1791 }
 0x347   : > { %4473 = vmatmul.mubr.msk.f32.vlgmr.msra.gmra.mxu1 %vm1230_vm3, %v1420_v13  ;;  %4479 = vmatprep.subr.mxu0 %v1586_v1 }
 0x348   : > { %4487 = vmatpush3.msra.mxu1 %v1694_v56  ;;  %4480 = vmatpush3.msra.mxu0 %v1586_v1 }
 0x349   : > { %4488 = vmatprep.subr.mxu1 %v1692_v39  ;;  %4481 = vmatprep.subr.mxu0 %v1584_v14 }
 0x34a   : > { %4489 = vmatpush3.msra.mxu1 %v1692_v39  ;;  %4494 = vmatprep.mubr.msk.f32.mxu1 %vm976_vm1, %v5242_v4  ;;  %v1794_v39 = vpop.permute.xlu0 %1793 }
 0x34b   : > { %4490 = vmatprep.subr.mxu1 %v1690_v57  ;;  %4482 = vmatpush3.msra.mxu0 %v1584_v14 }
 0x34c   : > { %4491 = vmatpush3.msra.mxu1 %v1690_v57  ;;  %4484 = vmatmul.mubr.msk.f32.vlgmr.msra.gmra.mxu0 %vm976_vm1, %v5259_v7 }
 0x34d   : > { %4492 = vmatprep.subr.mxu1 %v1688_v58  ;;  %4505 = vmatprep.mubr.msk.f32.mxu0 %vm976_vm1, %v5242_v4 }
 0x34e   : > { %4493 = vmatpush3.msra.mxu1 %v1688_v58  ;;  %4497 = vmatprep.subr.mxu0 %v1798_v37 }
 0x34f   : > { %4495 = vmatmul.mubr.msk.f32.vlgmr.msra.gmra.mxu1 %vm976_vm1, %v5259_v7  ;;  %4508 = vmatprep.subr.mxu1 %v4942_v12 }
 0x350   : > { %4510 = vmatprep.mubr.msk.f32.mxu1 %vm4943_vm2, %v4942_v12  ;;  %4498 = vmatpush3.msra.mxu0 %v1798_v37 }
 0x351   : > { %4499 = vmatprep.subr.mxu0 %v1796_v38 }
 0x352   : > { %4500 = vmatpush3.msra.mxu0 %v1796_v38 }
 0x353   : > { %4501 = vmatprep.subr.mxu0 %v1794_v39 }
 0x354   : > { %4502 = vmatpush3.msra.mxu0 %v1794_v39 }
 0x355   : > { %4503 = vmatprep.subr.mxu0 %v1792_v40 }
 0x356   : > { %4504 = vmatpush3.msra.mxu0 %v1792_v40 }
 0x357   : > { %4506 = vmatmul.mubr.msk.f32.vlgmr.msra.gmra.mxu0 %vm976_vm1, %v5259_v7  ;;  %4518 = vmatprep.subr.mxu0 %v4942_v12 }
 0x358   : > { %4520 = vmatprep.mubr.msk.f32.mxu0 %vm4943_vm2, %v4942_v12 }
 0x403   : > { %v1490_v15 = vpop.f32.mrf.mxu0 }
 0x404   : > { %1567 = vst.msk [vmem:[#allocation3] sm:$0xff] %vm1230_vm3, %v1490_v15 }
 0x405   : > { %v4469_v17 = vpop.f32.mrf.mxu0 }
 0x407   : > { %v1563_v19 = vpop.f32.mrf.mxu1 }
 0x408   : > { %1568 = vst.msk [vmem:[#allocation3 + $0x8] sm:$0xff] %vm1230_vm3, %v1563_v19 }
 0x409   : > { %v4474_v20 = vpop.f32.mrf.mxu1 }
 0x40c   : > { %v4485_v21 = vpop.f32.mrf.mxu0 }
 0x40d   : > { %v1670_v36 = vadd.f32 %v4485_v21, %v1596_v31 }
 0x40e   : > { %v1664_v32 = vpop.f32.mrf.mxu0 }
 0x40f   : > { %v4496_v22 = vpop.f32.mrf.mxu1  ;;  %v1665_v33 = vadd.f32 %v1664_v32, %v1596_v31 }
 0x410   : > { %v1774_v35 = vadd.f32 %v4496_v22, %v1700_v27 }
 0x411   : > { %v1768_v28 = vpop.f32.mrf.mxu1 }
 0x412   : > { %v1769_v29 = vadd.f32 %v1768_v28, %v1700_v27 }
 0x414   : > { %4509 = vmatpush3.xpose.msk.msra.mxu1 %vm1230_vm3, %v1769_v29 }
 0x415   : > { %4513 = vmatprep.subr.mxu1 %v4942_v12 }
 0x417   : > { %4511 = vmatmul.mubr.msk.f32.vlgmr.msra.gmra.mxu1 %vm1230_vm3, %v1665_v33  ;;  %v4507_v54 = vpop.f32.mrf.mxu0 }
 0x418   : > { %4514 = vmatpush3.xpose.msk.msra.mxu1 %vm1230_vm3, %v1774_v35  ;;  %4515 = vmatprep.mubr.msk.f32.mxu1 %vm4943_vm2, %v4942_v12 }
 0x419   : > { %4523 = vmatprep.subr.mxu1 %v4942_v12  ;;  %v1872_v58 = vpop.f32.mrf.mxu0 }
 0x41b   : > { %4516 = vmatmul.mubr.msk.f32.vlgmr.msra.gmra.mxu1 %vm1230_vm3, %v1670_v36 }
 0x41c   : > { %4525 = vmatprep.mubr.msk.f32.mxu1 %vm4943_vm2, %v4942_v12 }
 0x4d7   : > { %v1953_v42 = vpop.f32.mrf.mxu1 }
 0x4d8   : > { %v2033_v43 = vmul.f32 0.35355338, %v1953_v42 }
 0x4d9   : > { %v4512_v44 = vpop.f32.mrf.mxu1 }
 0x4da   : > { %v2035_v45 = vadd.f32 %v5361_v34, %v2033_v43 }
 0x4db   : > { %v2029_v46 = vpop.f32.mrf.mxu1 }
 0x4dc   : > { %v2034_v47 = vmul.f32 0.35355338, %v2029_v46  ;;  %v2037_v48 = vsel %vm1230_vm3, %v2035_v45, -inf }
 0x4dd   : > { %2038 = vmax.xlane.f32.xlu1 %v2037_v48  ;;  %v4517_v49 = vpop.f32.mrf.mxu1 }
 0x4de   : > { %v2036_v50 = vadd.f32 %v5356_v30, %v2034_v47 }
 0x4e0   : > { %v2040_v51 = vsel %vm1230_vm3, %v2036_v50, -inf }
 0x4e1   : > { %2041 = vmax.xlane.f32.xlu0 %v2040_v51 }
 0x4ee   : > { %2340 = vrot.lane.b32.xlu1 %v5262_v8, %s4945_s22 }
 0x4f2   : > { %2338 = vrot.lane.b32.xlu1 %v5267_v9, %s4945_s22 }
 0x4f6   : > { %2236 = vrot.lane.b32.xlu1 %v5236_v2, %s4945_s22 }
 0x4f7   : > { %1803 = vrot.lane.b32.xlu0 %v5384_v41, %s4944_s25  ;;  %s5781_s25 = sld [smem:[#allocation21_spill]] }
 0x4fa   : > { %2234 = vrot.lane.b32.xlu1 %v5239_v3, %s4945_s22 }
 0x4fe   : > { %2232 = vrot.lane.b32.xlu1 %v5246_v5, %s4945_s22 }
 0x502   : > { %2346 = vrot.lane.b32.xlu1 %v5297_v16, %s4945_s22 }
 0x506   : > { %2444 = vrot.lane.b32.xlu1 %v5321_v23, %s4945_s22 }
 0x50a   : > { %2440 = vrot.lane.b32.xlu1 %v5331_v25, %s4945_s22 }
 0x566   : > { %v2039_v52 = vpop.xlane.xlu1 %2038 }
 0x567   : > { %v2043_v53 = vsub.f32 %v2035_v45, %v2039_v52 }
 0x569   : > { %v2045_v55 = vmul.f32 1.442695, %v2043_v53 }
 0x56a   : > { %v2042_v56 = vpop.xlane.xlu0 %2041  ;;  %v2341_v14 = vpop.permute.xlu1 %2340 }
 0x56b   : > { %4764 = vpow2.f32 %v2045_v55  ;;  %v2044_v57 = vsub.f32 %v2036_v50, %v2042_v56 }
 0x56d   : > { %v2047_v59 = vmul.f32 1.442695, %v2044_v57 }
 0x56e   : > { %v1804_v60 = vpop.permute.xlu0 %1803  ;;  %v2339_v15 = vpop.permute.xlu1 %2338 }
 0x56f   : > { %4766 = vpow2.f32 %v2047_v59  ;;  %v1873_v61 = vadd.f32 %v1872_v58, %v1804_v60  ;;  %v1878_v62 = vadd.f32 %v4507_v54, %v1804_v60 }
 0x571   : > { %4519 = vmatpush3.msra.mxu0 %v1873_v61  ;;  %4524 = vmatpush3.msra.mxu1 %v1878_v62 }
 0x572   : > { %4539 = vmatprep.subr.mxu1 %v2341_v14  ;;  %v2237_v17 = vpop.permute.xlu1 %2236 }
 0x573   : > { %4528 = vmatprep.subr.mxu0 %v2237_v17 }
 0x576   : > { %v2235_v22 = vpop.permute.xlu1 %2234 }
 0x578   : > { %v4765_v63 = vpop.eup %4764 }
 0x579   : > { %v2049_v0 = vsel %vm1230_vm3, %v4765_v63, 0.0 }
 0x57a   : > { %2050 = vadd.xlane.f32.xlu0 %v2049_v0  ;;  %v2233_v32 = vpop.permute.xlu1 %2232 }
 0x57c   : > { %v4767_v1 = vpop.eup %4766 }
 0x57d   : > { %v2052_v13 = vsel %vm1230_vm3, %v4767_v1, 0.0 }
 0x57e   : > { %2053 = vadd.xlane.f32.xlu0 %v2052_v13  ;;  %v2347_v43 = vpop.permute.xlu1 %2346 }
 0x582   : > { %v2445_v51 = vpop.permute.xlu1 %2444 }
 0x586   : > { %v2441_v53 = vpop.permute.xlu1 %2440 }
 0x594   : > { %2336 = vrot.lane.b32.xlu0 %v5274_v10, %s4945_s22 }
 0x598   : > { %2334 = vrot.lane.b32.xlu0 %v5281_v11, %s4945_s22 }
 0x59c   : > { %2230 = vrot.lane.b32.xlu0 %v5255_v6, %s4945_s22 }
 0x5a0   : > { %2242 = vrot.lane.b32.xlu0 %v5304_v18, %s4945_s22 }
 0x5a4   : > { %2442 = vrot.lane.b32.xlu0 %v5324_v24, %s4945_s22 }
 0x5a8   : > { %2438 = vrot.lane.b32.xlu0 %v5336_v26, %s4945_s22 }
 0x603   : > { %v2051_v19 = vpop.xlane.xlu0 %2050 }
 0x604   : > { %4768 = vrcp.f32 %v2051_v19 }
 0x607   : > { %v2054_v20 = vpop.xlane.xlu0 %2053 }
 0x608   : > { %4770 = vrcp.f32 %v2054_v20 }
 0x60b   : > { %v2337_v21 = vpop.permute.xlu0 %2336 }
 0x60f   : > { %v2335_v28 = vpop.permute.xlu0 %2334 }
 0x611   : > { %v4769_v27 = vpop.eup %4768 }
 0x612   : > { %v2056_v29 = vmul.f32 %v4769_v27, %v4765_v63 }
 0x613   : > { %v2231_v35 = vpop.permute.xlu0 %2230 }
 0x614   : > { %4521 = vmatmul.mubr.msk.f32.vlgmr.msra.gmra.mxu0 %vm1230_vm3, %v2056_v29 }
 0x615   : > { %v4771_v31 = vpop.eup %4770  ;;  %4529 = vmatpush3.msra.mxu0 %v2237_v17  ;;  %4536 = vmatprep.mubr.msk.f32.mxu0 %vm976_vm1, %v5242_v4 }
 0x616   : > { %v2058_v33 = vmul.f32 %v4771_v31, %v4767_v1  ;;  %4530 = vmatprep.subr.mxu0 %v2235_v22 }
 0x617   : > { %4531 = vmatpush3.msra.mxu0 %v2235_v22  ;;  %v2243_v47 = vpop.permute.xlu0 %2242 }
 0x618   : > { %4526 = vmatmul.mubr.msk.f32.vlgmr.msra.gmra.mxu1 %vm1230_vm3, %v2058_v33  ;;  %4532 = vmatprep.subr.mxu0 %v2233_v32 }
 0x619   : > { %4540 = vmatpush3.msra.mxu1 %v2341_v14  ;;  %4533 = vmatpush3.msra.mxu0 %v2233_v32 }
 0x61a   : > { %4541 = vmatprep.subr.mxu1 %v2339_v15  ;;  %4534 = vmatprep.subr.mxu0 %v2231_v35 }
 0x61b   : > { %4542 = vmatpush3.msra.mxu1 %v2339_v15  ;;  %4547 = vmatprep.mubr.msk.f32.mxu1 %vm976_vm1, %v5242_v4  ;;  %v2443_v52 = vpop.permute.xlu0 %2442 }
 0x61c   : > { %4543 = vmatprep.subr.mxu1 %v2337_v21  ;;  %4535 = vmatpush3.msra.mxu0 %v2231_v35 }
 0x61d   : > { %4544 = vmatpush3.msra.mxu1 %v2337_v21  ;;  %4537 = vmatmul.mubr.msk.f32.vlgmr.msra.gmra.mxu0 %vm976_vm1, %v5259_v7 }
 0x61e   : > { %4545 = vmatprep.subr.mxu1 %v2335_v28  ;;  %4558 = vmatprep.mubr.msk.f32.mxu0 %vm976_vm1, %v5242_v4 }
 0x61f   : > { %4546 = vmatpush3.msra.mxu1 %v2335_v28  ;;  %4550 = vmatprep.subr.mxu0 %v2445_v51  ;;  %v2439_v54 = vpop.permute.xlu0 %2438 }
 0x620   : > { %4548 = vmatmul.mubr.msk.f32.vlgmr.msra.gmra.mxu1 %vm976_vm1, %v5259_v7  ;;  %4561 = vmatprep.subr.mxu1 %v4942_v12 }
 0x621   : > { %4563 = vmatprep.mubr.msk.f32.mxu1 %vm4943_vm2, %v4942_v12  ;;  %4551 = vmatpush3.msra.mxu0 %v2445_v51 }
 0x622   : > { %4552 = vmatprep.subr.mxu0 %v2443_v52 }
 0x623   : > { %4553 = vmatpush3.msra.mxu0 %v2443_v52 }
 0x624   : > { %4554 = vmatprep.subr.mxu0 %v2441_v53 }
 0x625   : > { %4555 = vmatpush3.msra.mxu0 %v2441_v53 }
 0x626   : > { %4556 = vmatprep.subr.mxu0 %v2439_v54 }
 0x627   : > { %4557 = vmatpush3.msra.mxu0 %v2439_v54 }
 0x628   : > { %4559 = vmatmul.mubr.msk.f32.vlgmr.msra.gmra.mxu0 %vm976_vm1, %v5259_v7  ;;  %4571 = vmatprep.subr.mxu0 %v4942_v12 }
 0x629   : > { %4573 = vmatprep.mubr.msk.f32.mxu0 %vm4943_vm2, %v4942_v12 }
 0x6d4   : > { %v5481_v36 = vpop.f32.mrf.mxu0 }
 0x6d6   : > { %v4522_v37 = vpop.f32.mrf.mxu0 }
 0x6d8   : > { %v5483_v38 = vpop.f32.mrf.mxu1 }
 0x6da   : > { %v4527_v39 = vpop.f32.mrf.mxu1 }
 0x6dd   : > { %v4538_v40 = vpop.f32.mrf.mxu0 }
 0x6de   : > { %v2317_v50 = vadd.f32 %v4538_v40, %v2243_v47 }
 0x6df   : > { %v2311_v46 = vpop.f32.mrf.mxu0 }
 0x6e0   : > { %v4549_v42 = vpop.f32.mrf.mxu1  ;;  %v2312_v48 = vadd.f32 %v2311_v46, %v2243_v47 }
 0x6e1   : > { %v2421_v49 = vadd.f32 %v4549_v42, %v2347_v43 }
 0x6e2   : > { %v2415_v44 = vpop.f32.mrf.mxu1 }
 0x6e3   : > { %v2416_v45 = vadd.f32 %v2415_v44, %v2347_v43 }
 0x6e5   : > { %4562 = vmatpush3.xpose.msk.msra.mxu1 %vm1230_vm3, %v2416_v45 }
 0x6e6   : > { %4566 = vmatprep.subr.mxu1 %v4942_v12 }
 0x6e8   : > { %4564 = vmatmul.mubr.msk.f32.vlgmr.msra.gmra.mxu1 %vm1230_vm3, %v2312_v48  ;;  %v4560_v13 = vpop.f32.mrf.mxu0 }
 0x6e9   : > { %4567 = vmatpush3.xpose.msk.msra.mxu1 %vm1230_vm3, %v2421_v49  ;;  %4568 = vmatprep.mubr.msk.f32.mxu1 %vm4943_vm2, %v4942_v12 }
 0x6ea   : > { %4576 = vmatprep.subr.mxu1 %v4942_v12  ;;  %v2519_v19 = vpop.f32.mrf.mxu0 }
 0x6ec   : > { %4569 = vmatmul.mubr.msk.f32.vlgmr.msra.gmra.mxu1 %vm1230_vm3, %v2317_v50 }
 0x6ed   : > { %4578 = vmatprep.mubr.msk.f32.mxu1 %vm4943_vm2, %v4942_v12 }
 0x7a8   : > { %v2600_v55 = vpop.f32.mrf.mxu1 }
 0x7a9   : > { %v2680_v56 = vmul.f32 0.35355338, %v2600_v55 }
 0x7aa   : > { %v4565_v57 = vpop.f32.mrf.mxu1 }
 0x7ab   : > { %v2682_v58 = vadd.f32 %v5361_v34, %v2680_v56 }
 0x7ac   : > { %v2676_v59 = vpop.f32.mrf.mxu1 }
 0x7ad   : > { %v2681_v60 = vmul.f32 0.35355338, %v2676_v59  ;;  %v2684_v61 = vsel %vm1230_vm3, %v2682_v58, -inf }
 0x7ae   : > { %2685 = vmax.xlane.f32.xlu0 %v2684_v61  ;;  %v4570_v62 = vpop.f32.mrf.mxu1 }
 0x7af   : > { %v2683_v63 = vadd.f32 %v5356_v30, %v2681_v60 }
 0x7b1   : > { %v2687_v0 = vsel %vm1230_vm3, %v2683_v63, -inf }
 0x7b2   : > { %2688 = vmax.xlane.f32.xlu1 %v2687_v0 }
 0x7c3   : > { %2450 = vrot.lane.b32.xlu1 %v5384_v41, %s4945_s22 }
 0x7c4   : > { %2987 = vrot.lane.b32.xlu0 %v5262_v8, %s4946_s7 }
 0x7c7   : > { %2985 = vrot.lane.b32.xlu1 %v5267_v9, %s4946_s7 }
 0x7cb   : > { %2883 = vrot.lane.b32.xlu1 %v5236_v2, %s4946_s7 }
 0x7cf   : > { %2983 = vrot.lane.b32.xlu1 %v5274_v10, %s4946_s7 }
 0x7d3   : > { %2981 = vrot.lane.b32.xlu1 %v5281_v11, %s4946_s7 }
 0x7d7   : > { %2877 = vrot.lane.b32.xlu1 %v5255_v6, %s4946_s7 }
 0x7db   : > { %2889 = vrot.lane.b32.xlu1 %v5304_v18, %s4946_s7 }
 0x7df   : > { %3089 = vrot.lane.b32.xlu1 %v5324_v24, %s4946_s7 }
 0x7e3   : > { %3085 = vrot.lane.b32.xlu1 %v5336_v26, %s4946_s7 }
 0x837   : > { %v2686_v8 = vpop.xlane.xlu0 %2685 }
 0x838   : > { %v2690_v2 = vsub.f32 %v2682_v58, %v2686_v8 }
 0x83a   : > { %v2692_v9 = vmul.f32 1.442695, %v2690_v2 }
 0x83b   : > { %v2689_v1 = vpop.xlane.xlu1 %2688  ;;  %v2988_v15 = vpop.permute.xlu0 %2987 }
 0x83c   : > { %4772 = vpow2.f32 %v2692_v9  ;;  %v2691_v10 = vsub.f32 %v2683_v63, %v2689_v1 }
 0x83e   : > { %v2694_v11 = vmul.f32 1.442695, %v2691_v10 }
 0x83f   : > { %v2451_v14 = vpop.permute.xlu1 %2450 }
 0x840   : > { %4774 = vpow2.f32 %v2694_v11  ;;  %v2525_v6 = vadd.f32 %v4560_v13, %v2451_v14  ;;  %v2520_v21 = vadd.f32 %v2519_v19, %v2451_v14 }
 0x842   : > { %4577 = vmatpush3.msra.mxu1 %v2525_v6  ;;  %4572 = vmatpush3.msra.mxu0 %v2520_v21 }
 0x843   : > { %4592 = vmatprep.subr.mxu1 %v2988_v15  ;;  %v2986_v20 = vpop.permute.xlu1 %2985 }
 0x847   : > { %v2884_v22 = vpop.permute.xlu1 %2883 }
 0x848   : > { %4581 = vmatprep.subr.mxu0 %v2884_v22 }
 0x849   : > { %v4773_v18 = vpop.eup %4772 }
 0x84a   : > { %v2696_v24 = vsel %vm1230_vm3, %v4773_v18, 0.0 }
 0x84b   : > { %2697 = vadd.xlane.f32.xlu0 %v2696_v24  ;;  %v2984_v29 = vpop.permute.xlu1 %2983 }
 0x84d   : > { %v4775_v17 = vpop.eup %4774 }
 0x84e   : > { %v2699_v26 = vsel %vm1230_vm3, %v4775_v17, 0.0 }
 0x84f   : > { %2700 = vadd.xlane.f32.xlu0 %v2699_v26  ;;  %v2982_v33 = vpop.permute.xlu1 %2981 }
 0x865   : > { %2881 = vrot.lane.b32.xlu0 %v5239_v3, %s4946_s7 }
 0x869   : > { %2879 = vrot.lane.b32.xlu0 %v5246_v5, %s4946_s7 }
 0x86d   : > { %2993 = vrot.lane.b32.xlu0 %v5297_v16, %s4946_s7 }
 0x871   : > { %3091 = vrot.lane.b32.xlu0 %v5321_v23, %s4946_s7 }
 0x875   : > { %3087 = vrot.lane.b32.xlu0 %v5331_v25, %s4946_s7  ;;  %v2878_v25 = vpop.permute.xlu1 %2877 }
 0x879   : > { %v2890_v47 = vpop.permute.xlu1 %2889 }
 0x87d   : > { %v3090_v52 = vpop.permute.xlu1 %3089 }
 0x881   : > { %v3086_v54 = vpop.permute.xlu1 %3085 }
 0x8d4   : > { %v2698_v27 = vpop.xlane.xlu0 %2697 }
 0x8d5   : > { %4776 = vrcp.f32 %v2698_v27  ;;  %v3515_v27 = vld [vmem:[%s5150_s27 + $0x18] sm:$0xff] }
 0x8d8   : > { %v2701_v28 = vpop.xlane.xlu0 %2700 }
 0x8d9   : > { %4778 = vrcp.f32 %v2701_v28  ;;  %v3514_v28 = vld [vmem:[%s5150_s27 + $0x10] sm:$0xff] }
 0x8dc   : > { %v2882_v31 = vpop.permute.xlu0 %2881 }
 0x8e0   : > { %v2880_v16 = vpop.permute.xlu0 %2879 }
 0x8e2   : > { %v4777_v32 = vpop.eup %4776 }
 0x8e3   : > { %v2703_v3 = vmul.f32 %v4777_v32, %v4773_v18 }
 0x8e4   : > { %v2994_v44 = vpop.permute.xlu0 %2993 }
 0x8e5   : > { %4574 = vmatmul.mubr.msk.f32.vlgmr.msra.gmra.mxu0 %vm1230_vm3, %v2703_v3 }
 0x8e6   : > { %v4779_v5 = vpop.eup %4778  ;;  %4582 = vmatpush3.msra.mxu0 %v2884_v22  ;;  %4589 = vmatprep.mubr.msk.f32.mxu0 %vm976_vm1, %v5242_v4 }
 0x8e7   : > { %v2705_v23 = vmul.f32 %v4779_v5, %v4775_v17  ;;  %4583 = vmatprep.subr.mxu0 %v2882_v31 }
 0x8e8   : > { %4584 = vmatpush3.msra.mxu0 %v2882_v31  ;;  %v3092_v51 = vpop.permute.xlu0 %3091  ;;  %v3512_v31 = vld [vmem:[%s5150_s27] sm:$0xff] }
 0x8e9   : > { %4579 = vmatmul.mubr.msk.f32.vlgmr.msra.gmra.mxu1 %vm1230_vm3, %v2705_v23  ;;  %4585 = vmatprep.subr.mxu0 %v2880_v16 }
 0x8ea   : > { %4593 = vmatpush3.msra.mxu1 %v2988_v15  ;;  %4586 = vmatpush3.msra.mxu0 %v2880_v16 }
 0x8eb   : > { %4594 = vmatprep.subr.mxu1 %v2986_v20  ;;  %4600 = vmatprep.mubr.msk.f32.mxu1 %vm976_vm1, %v5242_v4 }
 0x8ec   : > { %4595 = vmatpush3.msra.mxu1 %v2986_v20  ;;  %4587 = vmatprep.subr.mxu0 %v2878_v25  ;;  %v3088_v53 = vpop.permute.xlu0 %3087 }
 0x8ed   : > { %4596 = vmatprep.subr.mxu1 %v2984_v29  ;;  %4588 = vmatpush3.msra.mxu0 %v2878_v25 }
 0x8ee   : > { %4597 = vmatpush3.msra.mxu1 %v2984_v29  ;;  %4590 = vmatmul.mubr.msk.f32.vlgmr.msra.gmra.mxu0 %vm976_vm1, %v5259_v7  ;;  %v3513_v29 = vld [vmem:[%s5150_s27 + $0x8] sm:$0xff] }
 0x8ef   : > { %4598 = vmatprep.subr.mxu1 %v2982_v33  ;;  %4611 = vmatprep.mubr.msk.f32.mxu0 %vm976_vm1, %v5242_v4 }
 0x8f0   : > { %4599 = vmatpush3.msra.mxu1 %v2982_v33  ;;  %4603 = vmatprep.subr.mxu0 %v3092_v51 }
 0x8f1   : > { %4601 = vmatmul.mubr.msk.f32.vlgmr.msra.gmra.mxu1 %vm976_vm1, %v5259_v7  ;;  %4614 = vmatprep.subr.mxu1 %v4942_v12 }
 0x8f2   : > { %4616 = vmatprep.mubr.msk.f32.mxu1 %vm4943_vm2, %v4942_v12  ;;  %4604 = vmatpush3.msra.mxu0 %v3092_v51 }
 0x8f3   : > { %4605 = vmatprep.subr.mxu0 %v3090_v52 }
 0x8f4   : > { %4606 = vmatpush3.msra.mxu0 %v3090_v52 }
 0x8f5   : > { %4607 = vmatprep.subr.mxu0 %v3088_v53 }
 0x8f6   : > { %4608 = vmatpush3.msra.mxu0 %v3088_v53 }
 0x8f7   : > { %4609 = vmatprep.subr.mxu0 %v3086_v54 }
 0x8f8   : > { %4610 = vmatpush3.msra.mxu0 %v3086_v54 }
 0x8f9   : > { %4612 = vmatmul.mubr.msk.f32.vlgmr.msra.gmra.mxu0 %vm976_vm1, %v5259_v7  ;;  %4624 = vmatprep.subr.mxu0 %v4942_v12 }
 0x8fa   : > { %4626 = vmatprep.mubr.msk.f32.mxu0 %vm4943_vm2, %v4942_v12 }
 0x9a5   : > { %v2775_v35 = vpop.f32.mrf.mxu0 }
 0x9a7   : > { %v4575_v37 = vpop.f32.mrf.mxu0 }
 0x9a8   : > { %v4272_v37 = vld [vmem:[%s5780_s24] ss:$0 sm:$0xff] }
 0x9a9   : > { %v5551_v39 = vpop.f32.mrf.mxu1 }
 0x9ab   : > { %v4580_v40 = vpop.f32.mrf.mxu1 }
 0x9ae   : > { %v4591_v42 = vpop.f32.mrf.mxu0 }
 0x9af   : > { %v2964_v50 = vadd.f32 %v4591_v42, %v2890_v47 }
 0x9b0   : > { %v2958_v4 = vpop.f32.mrf.mxu0 }
 0x9b1   : > { %v4602_v43 = vpop.f32.mrf.mxu1  ;;  %v2959_v48 = vadd.f32 %v2958_v4, %v2890_v47  ;;  %v4797_v4 = vld [vmem:[#allocation2] sm:$0xff] }
 0x9b2   : > { %v3068_v49 = vadd.f32 %v4602_v43, %v2994_v44 }
 0x9b3   : > { %v3062_v45 = vpop.f32.mrf.mxu1 }
 0x9b4   : > { %v3063_v46 = vadd.f32 %v3062_v45, %v2994_v44  ;;  %v4796_v44 = vld [vmem:[#allocation2 + $0x8] sm:$0xff] }
 0x9b6   : > { %4615 = vmatpush3.xpose.msk.msra.mxu1 %vm1230_vm3, %v3063_v46 }
 0x9b7   : > { %4619 = vmatprep.subr.mxu1 %v4942_v12 }
 0x9b9   : > { %4617 = vmatmul.mubr.msk.f32.vlgmr.msra.gmra.mxu1 %vm1230_vm3, %v2959_v48  ;;  %v4613_v6 = vpop.f32.mrf.mxu0 }
 0x9ba   : > { %4620 = vmatpush3.xpose.msk.msra.mxu1 %vm1230_vm3, %v3068_v49  ;;  %4621 = vmatprep.mubr.msk.f32.mxu1 %vm4943_vm2, %v4942_v12  ;;  %v963_v49 = vld [vmem:[%s5781_s25] sm:$0xff] }
 0x9bb   : > { %4629 = vmatprep.subr.mxu1 %v4942_v12  ;;  %v3166_v18 = vpop.f32.mrf.mxu0 }
 0x9bd   : > { %4622 = vmatmul.mubr.msk.f32.vlgmr.msra.gmra.mxu1 %vm1230_vm3, %v2964_v50  ;;  %v4950_v50 = vmov 0  }
 0x9be   : > { %4631 = vmatprep.mubr.msk.f32.mxu1 %vm4943_vm2, %v4942_v12  ;;  %4754 = vset.pattern.permute.xlu1 %v4950_v50 }
 0x9bf   : > { %4755 = vset.pattern.permute.xlu0 %v4950_v50 }
 0xa79   : > { %v3247_v55 = vpop.f32.mrf.mxu1 }
 0xa7a   : > { %v3327_v56 = vmul.f32 0.35355338, %v3247_v55 }
 0xa7b   : > { %v4618_v57 = vpop.f32.mrf.mxu1 }
 0xa7c   : > { %v3329_v58 = vadd.f32 %v5361_v34, %v3327_v56 }
 0xa7d   : > { %v3323_v59 = vpop.f32.mrf.mxu1 }
 0xa7e   : > { %v3328_v60 = vmul.f32 0.35355338, %v3323_v59  ;;  %v3331_v61 = vsel %vm1230_vm3, %v3329_v58, -inf }
 0xa7f   : > { %3332 = vmax.xlane.f32.xlu0 %v3331_v61  ;;  %v4623_v62 = vpop.f32.mrf.mxu1  ;;  %v3666_v61 = vld [vmem:[%s5782_s1 + $0x18] sm:$0xff] }
 0xa80   : > { %v3330_v63 = vadd.f32 %v5356_v30, %v3328_v60  ;;  %v964_v62 = vld [vmem:[%s5781_s25 + $0x8] sm:$0xff] }
 0xa82   : > { %v3334_v7 = vsel %vm1230_vm3, %v3330_v63, -inf }
 0xa83   : > { %3335 = vmax.xlane.f32.xlu1 %v3334_v7  ;;  %v3664_v7 = vld [vmem:[%s5782_s1 + $0x8] sm:$0xff] }
 0xa94   : > { %2207 = vrot.lane.b32.xlu1 %v5481_v36, %s4947_s16 }
 0xa98   : > { %2209 = vrot.lane.b32.xlu1 %v5483_v38, %s4947_s16 }
 0xa9c   : > { %2854 = vrot.lane.b32.xlu1 %v2775_v35, %s4948_s5 }
 0xb08   : > { %v3333_v12 = vpop.xlane.xlu0 %3332 }
 0xb09   : > { %v3337_v34 = vsub.f32 %v3329_v58, %v3333_v12  ;;  %v3663_v12 = vld [vmem:[%s5782_s1] sm:$0xff] }
 0xb0b   : > { %v3339_v0 = vmul.f32 1.442695, %v3337_v34  ;;  %v3764_v34 = vld [vmem:[%s5214_s29 + $0x38] sm:$0xff] }
 0xb0c   : > { %v3336_v8 = vpop.xlane.xlu1 %3335 }
 0xb0d   : > { %4780 = vpow2.f32 %v3339_v0  ;;  %v3338_v2 = vsub.f32 %v3330_v63, %v3336_v8  ;;  %v3665_v63 = vld [vmem:[%s5782_s1 + $0x10] sm:$0xff]  ;;  %v3762_v8 = vld [vmem:[%s5214_s29 + $0x28] sm:$0xff] }
 0xb0e   : > { %v3763_v0 = vld [vmem:[%s5214_s29 + $0x30] sm:$0xff] }
 0xb0f   : > { %v3341_v30 = vmul.f32 1.442695, %v3338_v2  ;;  %v3761_v2 = vld [vmem:[%s5214_s29 + $0x20] sm:$0xff] }
 0xb10   : > { %v2208_v9 = vpop.permute.xlu1 %2207 }
 0xb11   : > { %4782 = vpow2.f32 %v3341_v30  ;;  %2214 = vst.msk [vmem:[#allocation3] sm:$0xff] %vm2213_vm4, %v2208_v9 }
 0xb14   : > { %v2210_v1 = vpop.permute.xlu1 %2209 }
 0xb15   : > { %2215 = vst.msk [vmem:[#allocation3 + $0x8] sm:$0xff] %vm2213_vm4, %v2210_v1 }
 0xb18   : > { %v2855_v36 = vpop.permute.xlu1 %2854 }
 0xb19   : > { %2861 = vst.msk [vmem:[#allocation3] sm:$0xff] %vm2860_vm5, %v2855_v36 }
 0xb1a   : > { %v4781_v38 = vpop.eup %4780 }
 0xb1b   : > { %v3343_v10 = vsel %vm1230_vm3, %v4781_v38, 0.0 }
 0xb1c   : > { %3344 = vadd.xlane.f32.xlu0 %v3343_v10 }
 0xb1e   : > { %v4783_v13 = vpop.eup %4782 }
 0xb1f   : > { %v3346_v11 = vsel %vm1230_vm3, %v4783_v13, 0.0 }
 0xb20   : > { %3347 = vadd.xlane.f32.xlu0 %v3346_v11  ;;  %v4275_v11 = vld [vmem:[%s5784_s13] ss:$0 sm:$0xff] }
 0xb36   : > { %3097 = vrot.lane.b32.xlu0 %v5384_v41, %s4946_s7 }
 0xb3a   : > { %2856 = vrot.lane.b32.xlu0 %v5551_v39, %s4948_s5  ;;  %s5785_s5 = sld [smem:[#allocation28_spill]] }
 0xba5   : > { %v3345_v14 = vpop.xlane.xlu0 %3344 }
 0xba6   : > { %4784 = vrcp.f32 %v3345_v14 }
 0xba9   : > { %v3348_v15 = vpop.xlane.xlu0 %3347 }
 0xbaa   : > { %4786 = vrcp.f32 %v3348_v15 }
 0xbad   : > { %v3098_v24 = vpop.permute.xlu0 %3097 }
 0xbae   : > { %v3172_v17 = vadd.f32 %v4613_v6, %v3098_v24  ;;  %v3167_v26 = vadd.f32 %v3166_v18, %v3098_v24 }
 0xbb0   : > { %4625 = vmatpush3.msra.mxu0 %v3167_v26  ;;  %4630 = vmatpush3.msra.mxu1 %v3172_v17 }
 0xbb1   : > { %v2857_v19 = vpop.permute.xlu0 %2856  ;;  %4634 = vmatprep.subr.mxu0 %v3515_v27  ;;  %4645 = vmatprep.subr.mxu1 %v3666_v61 }
 0xbb2   : > { %2862 = vst.msk [vmem:[#allocation3 + $0x8] sm:$0xff] %vm2860_vm5, %v2857_v19 }
 0xbb3   : > { %v4785_v41 = vpop.eup %4784 }
 0xbb4   : > { %v3350_v20 = vmul.f32 %v4785_v41, %v4781_v38 }
 0xbb6   : > { %4627 = vmatmul.mubr.msk.f32.vlgmr.msra.gmra.mxu0 %vm1230_vm3, %v3350_v20 }
 0xbb7   : > { %v4787_v21 = vpop.eup %4786  ;;  %4635 = vmatpush3.msra.mxu0 %v3515_v27  ;;  %v3760_v27 = vld [vmem:[%s5214_s29 + $0x18] sm:$0xff] }
 0xbb8   : > { %v3352_v22 = vmul.f32 %v4787_v21, %v4783_v13  ;;  %4636 = vmatprep.subr.mxu0 %v3514_v28 }
 0xbb9   : > { %4637 = vmatpush3.msra.mxu0 %v3514_v28  ;;  %v3759_v28 = vld [vmem:[%s5214_s29 + $0x10] sm:$0xff] }
 0xbba   : > { %4632 = vmatmul.mubr.msk.f32.vlgmr.msra.gmra.mxu1 %vm1230_vm3, %v3352_v22  ;;  %4638 = vmatprep.subr.mxu0 %v3513_v29 }
 0xbbb   : > { %4639 = vmatpush3.msra.mxu0 %v3513_v29  ;;  %4646 = vmatpush3.msra.mxu1 %v3666_v61  ;;  %v3758_v29 = vld [vmem:[%s5214_s29 + $0x8] sm:$0xff] }
 0xbbc   : > { %4640 = vmatprep.subr.mxu0 %v3512_v31  ;;  %4647 = vmatprep.subr.mxu1 %v3665_v63 }
 0xbbd   : > { %4641 = vmatpush3.msra.mxu0 %v3512_v31  ;;  %4648 = vmatpush3.msra.mxu1 %v3665_v63  ;;  %v3757_v31 = vld [vmem:[%s5214_s29] sm:$0xff] }
 0xbbe   : > { %4649 = vmatprep.subr.mxu1 %v3664_v7  ;;  %4656 = vmatprep.subr.mxu0 %v3764_v34  ;;  %v4283_v63 = vld [vmem:[%s945_s11] ss:$0 sm:$0xff] }
 0xbbf   : > { %4650 = vmatpush3.msra.mxu1 %v3664_v7 }
 0xbc0   : > { %4651 = vmatprep.subr.mxu1 %v3663_v12 }
 0xbc1   : > { %4652 = vmatpush3.msra.mxu1 %v3663_v12  ;;  %v4284_v12 = vld [vmem:[%s948_s12] ss:$0 sm:$0xff] }
 0xc76   : > { %v3422_v32 = vpop.f32.mrf.mxu0 }
 0xc77   : > { %3501 = vrot.lane.b32.xlu1 %v3422_v32, %s4949_s26  ;;  %v4277_v32 = vld [vmem:[%s934_s14] ss:$0 sm:$0xff] }
 0xc78   : > { %v4628_v3 = vpop.f32.mrf.mxu0 }
 0xc7a   : > { %v3495_v33 = vpop.f32.mrf.mxu1 }
 0xc7b   : > { %3503 = vrot.lane.b32.xlu0 %v3495_v33, %s4949_s26  ;;  %s5786_s26 = scalar_lea.vmem %s5785_s5, %s5164_s9 }
 0xc7c   : > { %v4633_v5 = vpop.f32.mrf.mxu1  ;;  %v4276_v6 = vld [vmem:[%s5786_s26] ss:$0 sm:$0xff] }
 0xce9   : > { %v3502_v16 = vpop.permute.xlu1 %3501 }
 0xcea   : > { %3508 = vst.msk [vmem:[#allocation3] sm:$0xff] %vm3507_vm6, %v3502_v16 }
 0xced   : > { %v3504_v23 = vpop.permute.xlu0 %3503 }
 0xcee   : > { %3509 = vst.msk [vmem:[#allocation3 + $0x8] sm:$0xff] %vm3507_vm6, %v3504_v23 }
 0xcf1   : > { %v3510_v25 = vld [vmem:[#allocation3] sm:$0xff] }
 0xcf2   : > { %4642 = vmatprep.mubr.msk.f32.mxu0 %vm976_vm1, %v3510_v25 }
 0xcf5   : > { %v3511_v35 = vld [vmem:[#allocation3 + $0x8] sm:$0xff] }
 0xcf6   : > { %4643 = vmatmul.mubr.msk.f32.vlgmr.msra.gmra.mxu0 %vm976_vm1, %v3511_v35  ;;  %v4280_v35 = vld [vmem:[%s942_s0] ss:$0 sm:$0xff] }
 0xcf7   : > { %4657 = vmatpush3.msra.mxu0 %v3764_v34 }
 0xcf8   : > { %4658 = vmatprep.subr.mxu0 %v3763_v0 }
 0xcf9   : > { %4659 = vmatpush3.msra.mxu0 %v3763_v0 }
 0xcfa   : > { %4660 = vmatprep.subr.mxu0 %v3762_v8 }
 0xcfb   : > { %4661 = vmatpush3.msra.mxu0 %v3762_v8 }
 0xcfc   : > { %4662 = vmatprep.subr.mxu0 %v3761_v2 }
 0xcfd   : > { %4663 = vmatpush3.msra.mxu0 %v3761_v2 }
 0xcfe   : > { %4664 = vmatprep.subr.mxu0 %v3760_v27 }
 0xcff   : > { %4665 = vmatpush3.msra.mxu0 %v3760_v27 }
 0xd00   : > { %4666 = vmatprep.subr.mxu0 %v3759_v28 }
 0xd01   : > { %4667 = vmatpush3.msra.mxu0 %v3759_v28 }
 0xd02   : > { %4668 = vmatprep.subr.mxu0 %v3758_v29 }
 0xd03   : > { %4669 = vmatpush3.msra.mxu0 %v3758_v29 }
 0xd04   : > { %4670 = vmatprep.subr.mxu0 %v3757_v31 }
 0xd05   : > { %4671 = vmatpush3.msra.mxu0 %v3757_v31 }
 0xdb6   : > { %v4644_v39 = vpop.f32.mrf.mxu0 }
 0xdb7   : > { %v3601_v40 = vadd.f32 %v4644_v39, %v4272_v37 }
 0xdb8   : > { %v3595_v42 = vpop.f32.mrf.mxu0 }
 0xdb9   : > { %v3596_v43 = vadd.f32 %v4272_v37, %v3595_v42  ;;  %v3605_v45 = vadd.f32 %v4796_v44, %v3601_v40 }
 0xdbb   : > { %v3609_v46 = vsel %vm976_vm1, %v3605_v45, 0.0  ;;  %v3604_v47 = vadd.f32 %v4797_v4, %v3596_v43 }
 0xdbc   : > { %3610 = vadd.xlane.f32.xlu0 %v3609_v46 }
 0xdbd   : > { %v3606_v48 = vsel %vm976_vm1, %v3604_v47, 0.0 }
 0xdbe   : > { %3607 = vadd.xlane.f32.xlu1 %v3606_v48 }
 0xdcf   : > { %3653 = vperm.xlu1 %4754, %v963_v49  }
 0xe45   : > { %v3611_v51 = vpop.xlane.xlu0 %3610 }
 0xe46   : > { %v3614_v52 = vmul.f32 0.03125, %v3611_v51 }
 0xe47   : > { %v3608_v53 = vpop.xlane.xlu1 %3607 }
 0xe48   : > { %v3613_v54 = vmul.f32 0.03125, %v3608_v53  ;;  %v3616_v55 = vsub.f32 %v3605_v45, %v3614_v52 }
 0xe4a   : > { %v3615_v56 = vsub.f32 %v3604_v47, %v3613_v54  ;;  %v3618_v59 = vmul.f32 %v3616_v55, %v3616_v55 }
 0xe4b   : > { %v5624_v24 = vpop.permute.xlu1 %3653 }
 0xe4c   : > { %v3617_v57 = vmul.f32 %v3615_v56, %v3615_v56  ;;  %v3622_v60 = vsel %vm976_vm1, %v3618_v59, 0.0 }
 0xe4e   : > { %v3619_v58 = vsel %vm976_vm1, %v3617_v57, 0.0 }
 0xe4f   : > { %3620 = vadd.xlane.f32.xlu0 %v3619_v58 }
 0xe53   : > { %3623 = vadd.xlane.f32.xlu0 %v3622_v60 }
 0xe69   : > { %3658 = vperm.xlu0 %4755, %v964_v62  }
 0xed8   : > { %v3621_v30 = vpop.xlane.xlu0 %3620 }
 0xed9   : > { %v3625_v9 = vmul.f32 0.03125, %v3621_v30 }
 0xedb   : > { %v3627_v1 = vadd.f32 1e-05, %v3625_v9 }
 0xedc   : > { %v3624_v36 = vpop.xlane.xlu0 %3623 }
 0xedd   : > { %4788 = vrsqrt.f32 %v3627_v1  ;;  %v3626_v38 = vmul.f32 0.03125, %v3624_v36 }
 0xedf   : > { %v3628_v10 = vadd.f32 1e-05, %v3626_v38 }
 0xee1   : > { %4790 = vrsqrt.f32 %v3628_v10 }
 0xee4   : > { %v5627_v20 = vpop.permute.xlu0 %3658 }
 0xeea   : > { %v4789_v13 = vpop.eup %4788 }
 0xeeb   : > { %v3631_v14 = vmul.f32 %v4789_v13, %v3615_v56 }
 0xeed   : > { %v3640_v15 = vmul.f32 %v4275_v11, %v3631_v14 }
 0xeee   : > { %v4791_v18 = vpop.eup %4790 }
 0xeef   : > { %v3649_v17 = vadd.f32 %v4276_v6, %v3640_v15  ;;  %v3632_v26 = vmul.f32 %v4791_v18, %v3616_v55 }
 0xef1   : > { %v3661_v19 = vmul.f32 %v5624_v24, %v3649_v17  ;;  %v3641_v41 = vmul.f32 %v4275_v11, %v3632_v26 }
 0xef3   : > { %4653 = vmatprep.mubr.msk.f32.mxu1 %vm976_vm1, %v3661_v19  ;;  %v3650_v21 = vadd.f32 %v4276_v6, %v3641_v41 }
 0xef5   : > { %v3662_v22 = vmul.f32 %v5627_v20, %v3650_v21 }
 0xef7   : > { %4654 = vmatmul.mubr.msk.f32.vlgmr.msra.gmra.mxu1 %vm976_vm1, %v3662_v22 }
 0xfb7   : > { %v4655_v3 = vpop.f32.mrf.mxu1 }
 0xfb8   : > { %v3752_v33 = vadd.f32 %v4655_v3, %v4277_v32 }
 0xfb9   : > { %v3746_v5 = vpop.f32.mrf.mxu1 }
 0xfba   : > { %v3747_v16 = vadd.f32 %v4277_v32, %v3746_v5  ;;  %v3756_v25 = vmax.f32 %v3752_v33, 0.0 }
 0xfbc   : > { %v3755_v23 = vmax.f32 %v3747_v16, 0.0 }
 0xfbe   : > { %4672 = vmatprep.mubr.msk.f32.mxu0 %vm3772_vm7, %v3755_v23 }
 0xfbf   : > { %4673 = vmatmul.mubr.msk.f32.vlgmr.msra.gmra.mxu0 %vm3772_vm7, %v3756_v25 }
0x107f   : > { %v4674_v37 = vpop.f32.mrf.mxu0 }
0x1080   : > { %v3851_v39 = vadd.f32 %v4674_v37, %v4280_v35 }
0x1081   : > { %v3845_v40 = vpop.f32.mrf.mxu0 }
0x1082   : > { %v3846_v42 = vadd.f32 %v4280_v35, %v3845_v40  ;;  %v3855_v43 = vadd.f32 %v3851_v39, %v3662_v22 }
0x1084   : > { %v3859_v44 = vsel %vm976_vm1, %v3855_v43, 0.0  ;;  %v3854_v45 = vadd.f32 %v3846_v42, %v3661_v19 }
0x1085   : > { %3860 = vadd.xlane.f32.xlu0 %v3859_v44 }
0x1086   : > { %v3856_v46 = vsel %vm976_vm1, %v3854_v45, 0.0 }
0x1087   : > { %3857 = vadd.xlane.f32.xlu1 %v3856_v46 }
0x110e   : > { %v3861_v4 = vpop.xlane.xlu0 %3860 }
0x110f   : > { %v3863_v47 = vmul.f32 0.03125, %v3861_v4 }
0x1110   : > { %v3858_v48 = vpop.xlane.xlu1 %3857 }
0x1111   : > { %v3862_v49 = vmul.f32 0.03125, %v3858_v48  ;;  %v3865_v50 = vsub.f32 %v3855_v43, %v3863_v47 }
0x1113   : > { %v3864_v51 = vsub.f32 %v3854_v45, %v3862_v49  ;;  %v3867_v54 = vmul.f32 %v3865_v50, %v3865_v50 }
0x1115   : > { %v3866_v52 = vmul.f32 %v3864_v51, %v3864_v51  ;;  %v3871_v55 = vsel %vm976_vm1, %v3867_v54, 0.0 }
0x1117   : > { %v3868_v53 = vsel %vm976_vm1, %v3866_v52, 0.0 }
0x1118   : > { %3869 = vadd.xlane.f32.xlu1 %v3868_v53 }
0x111c   : > { %3872 = vadd.xlane.f32.xlu1 %v3871_v55 }
0x11a1   : > { %v3870_v56 = vpop.xlane.xlu1 %3869 }
0x11a2   : > { %v3874_v57 = vmul.f32 0.03125, %v3870_v56 }
0x11a4   : > { %v3876_v58 = vadd.f32 1e-05, %v3874_v57 }
0x11a5   : > { %v3873_v59 = vpop.xlane.xlu1 %3872 }
0x11a6   : > { %4792 = vrsqrt.f32 %v3876_v58  ;;  %v3875_v60 = vmul.f32 0.03125, %v3873_v59 }
0x11a8   : > { %v3877_v61 = vadd.f32 1e-05, %v3875_v60 }
0x11aa   : > { %4794 = vrsqrt.f32 %v3877_v61 }
0x11b3   : > { %v4793_v62 = vpop.eup %4792 }
0x11b4   : > { %v3880_v7 = vmul.f32 %v4793_v62, %v3864_v51 }
0x11b6   : > { %v3889_v34 = vmul.f32 %v4283_v63, %v3880_v7 }
0x11b7   : > { %v4795_v0 = vpop.eup %4794 }
0x11b8   : > { %v3898_v8 = vadd.f32 %v4284_v12, %v3889_v34  ;;  %v3881_v2 = vmul.f32 %v4795_v0, %v3865_v50 }
0x11ba   : > { %v3900_v30 = vmul.f32 %v3898_v8, %v5624_v24  ;;  %v3890_v9 = vmul.f32 %v4283_v63, %v3881_v2 }
0x11bc   : > { %3902 = vst.msk [vmem:[#allocation2] sm:$0xff] %vm976_vm1, %v3900_v30  ;;  %v3899_v1 = vadd.f32 %v4284_v12, %v3890_v9  ;;  %3907 = sbr.rel (%p4285_p10) target bundleno = 4546 (0x11c2), region = 112 }
0x11be   : > { %v3901_v36 = vmul.f32 %v3899_v1, %v5627_v20 }
0x11c0   : > { %3903 = vst.msk [vmem:[#allocation2 + $0x8] sm:$0xff] %vm976_vm1, %v3901_v36 }
0x11c1   : > { %3908 = vst.msk [vmem:[#allocation9] sm:$0xff] %vm976_vm1, %v3900_v30  ;;  %3909 = vst.msk [vmem:[#allocation9 + $0x8] sm:$0xff] %vm976_vm1, %v3901_v36 }
0x11c2 PF: > { %s5791_s11 = sld [smem:[#allocation16_spill]]  ;;  %s4951_s19 = smov [#allocation9]  }
0x11c3   : > { %s3919_s28 = sshll.u32 %s4951_s19, 4  ;;  %s3920_s28 = int_to_ptr.vmem [resolvable:$true] %s3919_s28 }
0x11c4   : > { %s4854_s13 = scalar_lea.vmem %s3920_s28, 256  ;;  %p4861_p8 = scmp.lt.s32.totalorder %s3920_s28, %s3920_s28 }
0x11c5   : > { %p4855_p4 = scmp.ne.s32.totalorder %s3920_s28, %s4854_s13  ;;  %p4862_p11 = scmp.lt.s32.totalorder %s4854_s13, %s4854_s13 }
0x11c7   : > { %p4863_p12 = por %p4862_p11, %p4861_p8 }
0x11c8   : > { %s5792_s12 = sadd.s32 4294967295, %s5791_s11  }
0x11c9   : > { %p5669_p3 = scmp.eq.s32.totalorder %s5792_s12, 1 }
0x11cb   : > { %p4856_p5 = pnand %p4855_p4, %p5669_p3 }
0x11cd   : > { %p4857_p6 = pneg %p4856_p5 }
0x11cf   : > { %p4864_p13 = pnand %p4863_p12, %p4857_p6 }
0x11d1   : > { %4867 = shalt.err (!%p4864_p13)
}
0x11d2   : > { %s4952_s21 = smov 128   ;;  %s5794_s5 = sld [smem:[#allocation35_spill]] }
0x11d8   : > { %4680 = dma.vmem_to_hbm [thread:$0]  (%p5669_p3), %s3920_s28, 256, %s5794_s5, [#allocation6], %s4952_s21, %s4952_s21, %s4947_s16  }
0x11d9   : > { %4911 = dma.done.wait (%p5669_p3), [#allocation6], 256  }
0x11da   : > { %4913 = vsyncadd (%p5669_p3), [#allocation6], 4294967040 }
0x11db PF: > { %s5795_s26 = sld [smem:[#allocation16_spill]] }
0x11dc   : > { %s5796_s0 = sld [smem:[#allocation13_spill]] }
0x11dd   : > { %s5797_s30 = sld [smem:[#allocation14_spill]] }
0x11de   : > { %s5798_s20 = sld [smem:[#allocation18_spill]] }
0x11df   : > { %s5799_s21 = sld [smem:[#allocation15_spill]] }
0x11e0   : > { %s5800_s1 = sld [smem:[#allocation17_spill]] }
0x11e1   : > { %s36_s22 = sadd.s32 1, %s5795_s26  }
0x11e2   : > { %p33_p0 = scmp.ge.s32.totalorder %s36_s22, 4  }
0x11e4   :  { %35 = sbr.rel (!%p33_p0) target bundleno = 24 (0x18), region = 206 }
0x11e9   :  { %3935 = vsyncpa [#allocation5], 1 }
0x11ea   :  { %3937 = vsyncpa [#allocation5 + $0x1], 1 }
0x11eb   :  { %3938 = vsyncpa [#allocation8], 1 }
0x11ec   :  { %3940 = vsyncpa [#allocation8 + $0x1], 1 }
0x11ed   :  { %3941 = vsyncpa [#allocation6], 1 }
0x11ee   :  { %3943 = vsyncpa [#allocation6 + $0x1], 1 }

</bundles_post_ra>
